<compile_context>
chip_gen: v6e
topology: v6e:2x2x1
jax: 0.10.0
libtpu: 0.0.40
codegen_flags: <defaults>
</compile_context>

<pallas_src>
import math
from functools import partial

import jax
import jax.numpy as jnp
from jax import lax
from jax.experimental import pallas as pl
from jax.experimental.pallas import tpu as pltpu

LANE = 128      # TPU lane width (last dim)
SUBLANE = 8     # TPU sublane width (second-to-last dim)
UNROLL = 4      # manual unroll factor of the recurrence inner loop

# bf16 weights / gx / layer outputs (review item): halves HBM+VMEM and uses the
# full-rate MXU on v5e/v6e/v7x. Gate math and the hidden-state carry remain f32.
MATMUL_DTYPE = jnp.bfloat16


def _round_up(x, m):
    return ((x + m - 1) // m) * m


def _pick_tile(n, candidates):
    for c in candidates:
        if n % c == 0:
            return c
    return None


# ----------------------------------------------------------------------------
# Generic M/N-tiled linear: out = x @ w + b.  Grid over (M tiles, N tiles),
# both 'parallel'.  K kept whole per block (weights fit VMEM at these sizes).
# ----------------------------------------------------------------------------
def _linear_kernel(x_ref, w_ref, b_ref, o_ref):
    x = x_ref[...]
    w = w_ref[...]
    if x.dtype != w.dtype:                 # bf16-weight path: feed the MXU in bf16
        x = x.astype(w.dtype)
    acc = jnp.dot(x, w, preferred_element_type=jnp.float32) + b_ref[...].astype(jnp.float32)
    o_ref[...] = acc.astype(o_ref.dtype)


def linear_tiled(x2d, w_t, b_row, *, out_dtype=jnp.float32):
    """x2d: (M, K) @ w_t: (K, N) + b_row: (1, N) -> (M, N)."""
    M, K = x2d.shape
    N = w_t.shape[1]
    tm = _pick_tile(M, (512, 256, 128, 64, 32, 16, 8))
    if tm is None:                               # generic fallback: pad M
        tm = min(256, _round_up(M, SUBLANE))
        Mp = _round_up(M, tm)
        x2d = jnp.pad(x2d, ((0, Mp - M), (0, 0)))
    else:
        Mp = M
    tn = _pick_tile(N, (256, 512, 128)) or N     # 256-lane tiles preferred (MXU width)
    # TODO(synk): tile K with an 'arbitrary' accumulation axis for very large K*N weights.
    out = pl.pallas_call(
        _linear_kernel,
        out_shape=jax.ShapeDtypeStruct((Mp, N), out_dtype),
        grid=(Mp // tm, N // tn),
        in_specs=[
            pl.BlockSpec((tm, K), lambda i, j: (i, 0)),
            pl.BlockSpec((K, tn), lambda i, j: (0, j)),   # weight: constant across i
            pl.BlockSpec((1, tn), lambda i, j: (0, j)),   # bias
        ],
        out_specs=pl.BlockSpec((tm, tn), lambda i, j: (i, j)),
        compiler_params=pltpu.CompilerParams(
            dimension_semantics=("parallel", "parallel"),
            vmem_limit_bytes=48 * 1024 * 1024),           # v7x-safe (64 MiB physical)
    )(x2d, w_t, b_row)
    return out[:M] if Mp != M else out


# ----------------------------------------------------------------------------
# Gaussian smoothing (depthwise conv1d, padding='same'), time-major.
# Windowed Toeplitz band matmul: output rows [i*tm, i*tm+tm) only need padded-input
# rows [i*tm, i*tm+2*tm), so each grid step does two (tm,tm)@(tm, Bp*C) MXU matmuls
# against CONSTANT band tiles -> O(T*tm) flops / VMEM instead of O(T^2).
# ----------------------------------------------------------------------------
def _smooth_kernel(band_a_ref, band_b_ref, xa_ref, xb_ref, o_ref):
    acc = jnp.dot(band_a_ref[...], xa_ref[...], preferred_element_type=jnp.float32)
    acc = acc + jnp.dot(band_b_ref[...], xb_ref[...], preferred_element_type=jnp.float32)
    o_ref[...] = acc.astype(o_ref.dtype)


def gaussian_smooth_tm(x_tbc, kernel_size=20, sigma=2.0):
    """x_tbc: (T, Bp, C) f32 -> (T, Bp, C) f32, smoothed along T."""
    T, Bp, C = x_tbc.shape
    N = Bp * C
    # Same (quirky) tap formula as the reference GaussianSmoothing module.
    mean = (kernel_size - 1) / 2.0
    taps = [math.exp(-(((k - mean) / (2.0 * sigma)) ** 2) / 2.0)
            for k in range(kernel_size)]
    s = sum(taps)
    taps = [t / s for t in taps]
    pad_l = (kernel_size - 1) // 2            # 'same' padding: extra tap on the right

    tm = min(256, _round_up(T, SUBLANE))
    tm = max(tm, _round_up(kernel_size, SUBLANE))   # window (K-1) must fit in 2 tiles
    nT = -(-T // tm)
    rows = (nT + 1) * tm                            # so the i+1 row-tile always exists

    x2d = x_tbc.reshape(T, N)
    xpad = jnp.pad(x2d, ((pad_l, rows - pad_l - T), (0, 0)))   # (rows, N)

    taps_arr = jnp.asarray(taps, jnp.float32)
    r_idx = jnp.arange(tm)[:, None]
    c_idx = jnp.arange(tm)[None, :]

    def band(offset):
        k = c_idx + offset - r_idx
        return jnp.where((k >= 0) & (k < kernel_size),
                         taps_arr[jnp.clip(k, 0, kernel_size - 1)],
                         0.0).astype(jnp.float32)

    band_a = band(0)          # taps hitting the same row-tile
    band_b = band(tm)         # taps spilling into the next row-tile

    out = pl.pallas_call(
        _smooth_kernel,
        out_shape=jax.ShapeDtypeStruct((nT * tm, N), jnp.float32),
        grid=(nT,),
        in_specs=[
            pl.BlockSpec((tm, tm), lambda i: (0, 0)),     # constant band tiles
            pl.BlockSpec((tm, tm), lambda i: (0, 0)),
            pl.BlockSpec((tm, N), lambda i: (i, 0)),
            pl.BlockSpec((tm, N), lambda i: (i + 1, 0)),
        ],
        out_specs=pl.BlockSpec((tm, N), lambda i: (i, 0)),
        compiler_params=pltpu.CompilerParams(dimension_semantics=("parallel",)),
    )(band_a, band_b, xpad, xpad)
    return out[:T].reshape(T, Bp, C)


# ----------------------------------------------------------------------------
# nn.Unfold((kernelLen,1), stride), time-major, via static strided slices.
# feat[l, b, c*K + k] = x[l*stride + k, b, c]  (same feature ordering as torch).
# ----------------------------------------------------------------------------
def unfold_time_tm(x_tbc, kernel_len, stride_len):
    T, Bp, C = x_tbc.shape
    L = (T - kernel_len) // stride_len + 1
    cols = []
    for k in range(kernel_len):
        sl = lax.slice(x_tbc, (k, 0, 0),
                       (k + (L - 1) * stride_len + 1, Bp, C),
                       (stride_len, 1, 1))                                # (L, Bp, C)
        cols.append(sl)
    win = jnp.stack(cols, axis=-1)                                        # (L, Bp, C, K)
    return win.reshape(L, Bp, C * kernel_len)
# TODO(synk): fold the unfold into the layer-0 projection (gx0 = sum_k X[l*stride+k] @ W_k)
# to avoid materializing the K-times-inflated tensor in HBM.


# ----------------------------------------------------------------------------
# GRU recurrence: grid=(D, Lp//TL).  D axis 'parallel' (fwd/bwd land on separate
# TensorCores on v7x); time axis 'arbitrary' with the hidden state carried in a VMEM
# scratch across chunks, so gx chunk t+1 DMA overlaps chunk t compute.  gx is laid
# out time-major as (Lp, Bp, D*3Hp); a direction is just a lane-column block (no
# transposes).  The reverse direction reverses the chunk index in the index_map.
# ----------------------------------------------------------------------------
def _gru_chunk_kernel(gx_ref, whh_ref, bhh_ref, out_ref, h_ref, *, L_real, nT):
    # gx_ref: (TL, Bp, 3Hp)  whh_ref: (Hp, 3Hp)  bhh_ref: (1, 3Hp)
    # out_ref: (TL, Bp, Hp)  h_ref (scratch): (Bp, Hp) f32, persists across chunks.
    TL, Bp, G3 = gx_ref.shape
    Hp = G3 // 3
    t = pl.program_id(1)
    reverse = pl.program_id(0) == 1        # direction 1 of a bidirectional GRU runs R->L

    @pl.when(t == 0)
    def _():
        h_ref[...] = jnp.zeros_like(h_ref)

    whh = whh_ref[...]
    # Hoisted broadcast (not re-executed per step).
    bhh = jnp.broadcast_to(bhh_ref[...], (Bp, G3)).astype(jnp.float32)

    need_mask = L_real < nT * TL           # static: time axis was padded
    chunk = jnp.where(reverse, nT - 1 - t, t)
    base = chunk * TL

    # TODO(synk): hold W_hh resident in the MXU across steps via
    # pltpu.matmul_push_rhs / matmul_acc_lhs / matmul_pop (RHS re-stream dominates
    # the per-step cost with only Bp(=8) LHS rows).
    def block_step(blk, h):
        for j in range(UNROLL):            # manual 4x unroll: gives the scheduler ILP
            s = blk * UNROLL + j
            ti = jnp.where(reverse, TL - 1 - s, s)
            gx = gx_ref[ti].astype(jnp.float32)                           # (Bp, 3Hp)
            gh = jnp.dot(h.astype(whh.dtype), whh,
                         preferred_element_type=jnp.float32) + bhh        # (Bp, 3Hp)
            # PyTorch gate order [r, z, n]; Hp % 128 == 0 so slices are lane aligned.
            r = jax.nn.sigmoid(gx[:, 0:Hp] + gh[:, 0:Hp])
            z = jax.nn.sigmoid(gx[:, Hp:2 * Hp] + gh[:, Hp:2 * Hp])
            n = jnp.tanh(gx[:, 2 * Hp:3 * Hp] + r * gh[:, 2 * Hp:3 * Hp])
            h_new = (1.0 - z) * n + z * h
            if need_mask:                  # padded time steps must not perturb h
                h_new = jnp.where(base + ti < L_real, h_new, h)
            out_ref[ti] = h_new.astype(out_ref.dtype)
            h = h_new
        return h

    h_ref[...] = lax.fori_loop(0, TL // UNROLL, block_step, h_ref[...])


def _choose_time_chunk(L, Bp, Hp, itemsize):
    """Chunk length so 2 buffers of (gx chunk + out chunk) stay within ~16 MiB."""
    budget = 16 * 1024 * 1024
    per_step = 2 * Bp * 4 * Hp * itemsize          # double-buffered (3Hp gx + Hp out)
    tl = max(1, min(L, budget // per_step, 128))
    return _round_up(tl, UNROLL)


def gru_recurrence(gx, w_hh_t, b_hh, *, L_real, time_chunk, out_dtype):
    """gx: (Lp, Bp, D*3Hp); w_hh_t: (D, Hp, 3Hp); b_hh: (D, 1, 3Hp)
    -> (Lp, Bp, D*Hp) time-major, directions as [fwd | bwd] lane blocks."""
    Lp, Bp, _ = gx.shape
    D, Hp, G3 = w_hh_t.shape
    assert time_chunk % UNROLL == 0 and Lp % time_chunk == 0
    TL = time_chunk
    nT = Lp // TL

    def io_map(d, t):
        # forward direction walks chunks 0..nT-1; reverse walks nT-1..0
        return (t + d * (nT - 1 - 2 * t), 0, d)

    kernel = partial(_gru_chunk_kernel, L_real=L_real, nT=nT)
    # TODO(synk): fuse fwd/bwd into one kernel body on single-TC chips (v5e/v6e) to
    # overlap one direction's MXU fill/drain with the other's EUP work.
    return pl.pallas_call(
        kernel,
        out_shape=jax.ShapeDtypeStruct((Lp, Bp, D * Hp), out_dtype),
        grid=(D, nT),
        in_specs=[
            pl.BlockSpec((TL, Bp, G3), io_map),
            pl.BlockSpec((None, Hp, G3), lambda d, t: (d, 0, 0)),
            pl.BlockSpec((None, 1, G3), lambda d, t: (d, 0, 0)),
        ],
        out_specs=pl.BlockSpec((TL, Bp, Hp), io_map),
        scratch_shapes=[pltpu.VMEM((Bp, Hp), jnp.float32)],
        compiler_params=pltpu.CompilerParams(
            dimension_semantics=("parallel", "arbitrary"),
            vmem_limit_bytes=48 * 1024 * 1024),            # v7x-safe explicit budget
    )(gx, w_hh_t, b_hh)


# ----------------------------------------------------------------------------
# Full GRUEncoder forward (eval mode)
# ----------------------------------------------------------------------------
@partial(jax.jit, static_argnames=("stride_len", "kernel_len", "out_dim",
                                   "smooth_size", "smooth_sigma"))
def gru_encoder_forward(neural_input, params, *, stride_len, kernel_len, out_dim,
                        smooth_size=20, smooth_sigma=2.0):
    B, T, C = neural_input.shape
    w_hh0 = params["gru"][0]["w_hh_t"]
    D, Hp = w_hh0.shape[0], w_hh0.shape[1]
    Ep = params["fc_w_t"].shape[1]

    Bp = _round_up(B, SUBLANE)                      # pad batch to full sublanes
    x = neural_input if Bp == B else jnp.pad(
        neural_input, ((0, Bp - B), (0, 0), (0, 0)))
    x_tbc = jnp.transpose(x, (1, 0, 2))             # one small transpose at entry

    # 1) Gaussian smoothing along time (windowed banded MXU matmul).
    smoothed = gaussian_smooth_tm(x_tbc, smooth_size, smooth_sigma)       # (T, Bp, C)

    # 2) Unfold -> (L, Bp, C*kernel_len), stored bf16 (halves the HBM round trip).
    feat = unfold_time_tm(smoothed, kernel_len, stride_len).astype(MATMUL_DTYPE)
    L = feat.shape[0]

    # Pad time once to a multiple of the recurrence chunk; padded steps are masked.
    TL = _choose_time_chunk(L, Bp, Hp, jnp.dtype(MATMUL_DTYPE).itemsize)
    Lp = _round_up(L, TL)
    if Lp != L:
        feat = jnp.pad(feat, ((0, Lp - L), (0, 0), (0, 0)))

    # 3) GRU stack: one big input-projection matmul + one chunked recurrence per layer,
    #    all time-major -> no per-layer transposes.
    for lp in params["gru"]:
        gx2d = linear_tiled(feat.reshape(Lp * Bp, -1), lp["w_ih_t"], lp["b_ih"],
                            out_dtype=MATMUL_DTYPE)                       # (Lp*Bp, D*3Hp)
        gx = gx2d.reshape(Lp, Bp, D * 3 * Hp)
        feat = gru_recurrence(gx, lp["w_hh_t"], lp["b_hh"], L_real=L,
                              time_chunk=TL, out_dtype=MATMUL_DTYPE)      # (Lp, Bp, D*Hp)
        # TODO(synk): nn.GRU inter-layer dropout is train-only; eval forward is identity.

    # 4) fc_out (padded to 128 lanes inside; slice real rows/cols + final transpose).
    out2d = linear_tiled(feat.reshape(Lp * Bp, -1), params["fc_w_t"], params["fc_b"],
                         out_dtype=jnp.float32)
    out = out2d.reshape(Lp, Bp, Ep)[:L, :B, :out_dim]
    return jnp.transpose(out, (1, 0, 2))            # (B, L, out_dim)


# ----------------------------------------------------------------------------
# Parameter init (PyTorch-equivalent init), packed into the padded/transposed layout
# used by the kernels.  Gate blocks are zero-padded H -> Hp (multiple of 128) so gate
# slices are lane aligned; with h0 = 0 the padded hidden columns stay exactly zero
# through the recurrence, so results match the unpadded module.
# ----------------------------------------------------------------------------
def _pad_blocks(w, num_blocks, H, Hp, axis):
    if Hp == H:
        return w
    chunks = jnp.split(w, num_blocks, axis=axis)
    pad = [(0, 0)] * w.ndim
    pad[axis] = (0, Hp - H)
    return jnp.concatenate([jnp.pad(c, pad) for c in chunks], axis=axis)


def init_params(key, neural_dim, kernel_len, hidden_dim, num_layers,
                bidirectional, out_dim):
    D = 2 if bidirectional else 1
    H = hidden_dim
    Hp = _round_up(H, LANE)
    Ep = _round_up(out_dim, LANE)
    in0 = neural_dim * kernel_len
    bound_h = 1.0 / math.sqrt(H)
    ortho = jax.nn.initializers.orthogonal()

    gru_layers = []
    for layer in range(num_layers):
        in_size = in0 if layer == 0 else H * D
        w_ih_cols, b_ih_cols, w_hh_dirs, b_hh_dirs = [], [], [], []
        for _ in range(D):
            key, k1, k2, k3, k4 = jax.random.split(key, 5)
            bound_x = math.sqrt(6.0 / (in_size + 3 * H))                  # xavier_uniform
            w_ih = jax.random.uniform(k1, (3 * H, in_size), minval=-bound_x,
                                      maxval=bound_x, dtype=jnp.float32)
            w_hh = ortho(k2, (3 * H, H), jnp.float32)                     # orthogonal
            b_ih = jax.random.uniform(k3, (3 * H,), minval=-bound_h,
                                      maxval=bound_h, dtype=jnp.float32)
            b_hh = jax.random.uniform(k4, (3 * H,), minval=-bound_h,
                                      maxval=bound_h, dtype=jnp.float32)

            w_ih_p = _pad_blocks(w_ih, 3, H, Hp, axis=0)                  # (3Hp, in)
            if layer > 0:                                                 # per-direction input pad
                w_ih_p = _pad_blocks(w_ih_p, D, H, Hp, axis=1)            # (3Hp, D*Hp)
            w_hh_p = _pad_blocks(w_hh, 3, H, Hp, axis=0)                  # (3Hp, H)
            w_hh_p = jnp.pad(w_hh_p, ((0, 0), (0, Hp - H)))               # (3Hp, Hp)
            b_ih_p = _pad_blocks(b_ih, 3, H, Hp, axis=0)
            b_hh_p = _pad_blocks(b_hh, 3, H, Hp, axis=0)

            w_ih_cols.append(w_ih_p.T.astype(MATMUL_DTYPE))               # (In_p, 3Hp)
            b_ih_cols.append(b_ih_p)
            w_hh_dirs.append(w_hh_p.T.astype(MATMUL_DTYPE))               # (Hp, 3Hp)
            b_hh_dirs.append(b_hh_p.reshape(1, 3 * Hp))

        gru_layers.append(dict(
            w_ih_t=jnp.concatenate(w_ih_cols, axis=1),                    # (In_p, D*3Hp)
            b_ih=jnp.concatenate(b_ih_cols).reshape(1, D * 3 * Hp),
            w_hh_t=jnp.stack(w_hh_dirs, axis=0),                          # (D, Hp, 3Hp)
            b_hh=jnp.stack(b_hh_dirs, axis=0),                            # (D, 1, 3Hp)
        ))

    key, k1, k2 = jax.random.split(key, 3)
    fc_in = H * D
    bound_fc = 1.0 / math.sqrt(fc_in)
    fc_w = jax.random.uniform(k1, (out_dim, fc_in), minval=-bound_fc,
                              maxval=bound_fc, dtype=jnp.float32)
    fc_b = jax.random.uniform(k2, (out_dim,), minval=-bound_fc,
                              maxval=bound_fc, dtype=jnp.float32)
    fc_w_p = _pad_blocks(fc_w, D, H, Hp, axis=1)                          # (E, D*Hp)
    fc_w_p = jnp.pad(fc_w_p, ((0, Ep - out_dim), (0, 0)))                 # (Ep, D*Hp)
    fc_b_p = jnp.pad(fc_b, (0, Ep - out_dim))
    return dict(gru=gru_layers,
                fc_w_t=fc_w_p.T.astype(MATMUL_DTYPE),                     # (D*Hp, Ep)
                fc_b=fc_b_p.reshape(1, Ep))


# ----------------------------------------------------------------------------
if __name__ == "__main__":
    # Small, module-consistent shapes.
    B, T = 2, 32
    neural_dim = 16
    hidden_dim = 32
    layer_dim = 2
    stride_len = 4
    kernel_len = 8
    output_embed_dim = 8
    bidirectional = True

    key = jax.random.PRNGKey(0)
    kx, kp = jax.random.split(key)
    x = jax.random.normal(kx, (B, T, neural_dim), dtype=jnp.float32)
    params = init_params(kp, neural_dim, kernel_len, hidden_dim, layer_dim,
                         bidirectional, output_embed_dim)

    out = gru_encoder_forward(
        x, params,
        stride_len=stride_len, kernel_len=kernel_len, out_dim=output_embed_dim,
        smooth_size=20, smooth_sigma=2.0,
    )
    out = jax.block_until_ready(out)

    L = (T - kernel_len) // stride_len + 1
    assert out.shape == (B, L, output_embed_dim), out.shape
    assert bool(jnp.all(jnp.isfinite(out)))
    print("KERNEL_OK")
</pallas_src>

<mosaic_0001>
module attributes {stable_mosaic.version = 11 : i64} {
  func.func @_smooth_kernel(%arg0: i32, %arg1: memref<32x32xf32, #tpu.memory_space<vmem>>, %arg2: memref<32x32xf32, #tpu.memory_space<vmem>>, %arg3: memref<32x128xf32, #tpu.memory_space<vmem>>, %arg4: memref<32x128xf32, #tpu.memory_space<vmem>>, %arg5: memref<32x128xf32, #tpu.memory_space<vmem>>) attributes {dimension_semantics = [#tpu.dimension_semantics<parallel>], iteration_bounds = array<i64: 1>, scalar_prefetch = 0 : i64, scratch_operands = 0 : i64, tpu.core_type = #tpu.core_type<tc>, window_params = [{pipeline_mode = #tpu.pipeline_mode<synchronous>, transform_indices = @transform_0, window_bounds = array<i64: 32, 32>}, {pipeline_mode = #tpu.pipeline_mode<synchronous>, transform_indices = @transform_1, window_bounds = array<i64: 32, 32>}, {transform_indices = @transform_2, window_bounds = array<i64: 32, 128>}, {transform_indices = @transform_3, window_bounds = array<i64: 32, 128>}, {transform_indices = @transform_4, window_bounds = array<i64: 32, 128>}]} {
    %c0 = arith.constant 0 : index
    %c0_0 = arith.constant 0 : index
    %0 = vector.load %arg1[%c0, %c0_0] : memref<32x32xf32, #tpu.memory_space<vmem>>, vector<32x32xf32>
    %c0_1 = arith.constant 0 : index
    %c0_2 = arith.constant 0 : index
    %1 = vector.load %arg3[%c0_1, %c0_2] : memref<32x128xf32, #tpu.memory_space<vmem>>, vector<32x128xf32>
    %cst = arith.constant dense<0.000000e+00> : vector<32x128xf32>
    %2 = tpu.matmul %0, %1, %cst {dimension_numbers = #tpu.dot_dimension_numbers<[1], [0], [0], [1], [0, 0, 1, 1], [], []>} : vector<32x32xf32>, vector<32x128xf32>, vector<32x128xf32> -> vector<32x128xf32>
    %c0_3 = arith.constant 0 : index
    %c0_4 = arith.constant 0 : index
    %3 = vector.load %arg2[%c0_3, %c0_4] : memref<32x32xf32, #tpu.memory_space<vmem>>, vector<32x32xf32>
    %c0_5 = arith.constant 0 : index
    %c0_6 = arith.constant 0 : index
    %4 = vector.load %arg4[%c0_5, %c0_6] : memref<32x128xf32, #tpu.memory_space<vmem>>, vector<32x128xf32>
    %cst_7 = arith.constant dense<0.000000e+00> : vector<32x128xf32>
    %5 = tpu.matmul %3, %4, %cst_7 {dimension_numbers = #tpu.dot_dimension_numbers<[1], [0], [0], [1], [0, 0, 1, 1], [], []>} : vector<32x32xf32>, vector<32x128xf32>, vector<32x128xf32> -> vector<32x128xf32>
    %6 = arith.addf %2, %5 : vector<32x128xf32>
    %c0_8 = arith.constant 0 : index
    %c0_9 = arith.constant 0 : index
    %7 = vector.load %arg5[%c0_8, %c0_9] : memref<32x128xf32, #tpu.memory_space<vmem>>, vector<32x128xf32>
    tpu.vector_store %arg5[%c0_8, %c0_9], %6 {strides = array<i32>} : memref<32x128xf32, #tpu.memory_space<vmem>>, vector<32x128xf32>,
    return
  }
  func.func @transform_0(%arg0: i32) -> (i32, i32) {
    %c0_i32 = arith.constant 0 : i32
    %c0_i32_0 = arith.constant 0 : i32
    %c0_i32_1 = arith.constant 0 : i32
    return %c0_i32, %c0_i32_0 : i32, i32
  }
  func.func @transform_1(%arg0: i32) -> (i32, i32) {
    %c0_i32 = arith.constant 0 : i32
    %c0_i32_0 = arith.constant 0 : i32
    %c0_i32_1 = arith.constant 0 : i32
    return %c0_i32, %c0_i32_0 : i32, i32
  }
  func.func @transform_2(%arg0: i32) -> (i32, i32) {
    %c0_i32 = arith.constant 0 : i32
    %c0_i32_0 = arith.constant 0 : i32
    return %arg0, %c0_i32 : i32, i32
  }
  func.func @transform_3(%arg0: i32) -> (i32, i32) {
    %c1_i32 = arith.constant 1 : i32
    %0 = arith.addi %arg0, %c1_i32 : i32
    %c0_i32 = arith.constant 0 : i32
    %c0_i32_0 = arith.constant 0 : i32
    return %0, %c0_i32 : i32, i32
  }
  func.func @transform_4(%arg0: i32) -> (i32, i32) {
    %c0_i32 = arith.constant 0 : i32
    %c0_i32_0 = arith.constant 0 : i32
    return %arg0, %c0_i32 : i32, i32
  }
}

module attributes {stable_mosaic.version = 11 : i64} {
  func.func @_linear_kernel(%arg0: i32, %arg1: i32, %arg2: memref<64x128xbf16, #tpu.memory_space<vmem>>, %arg3: memref<128x256xbf16, #tpu.memory_space<vmem>>, %arg4: memref<1x256xf32, #tpu.memory_space<vmem>>, %arg5: memref<64x256xbf16, #tpu.memory_space<vmem>>) attributes {dimension_semantics = [#tpu.dimension_semantics<parallel>, #tpu.dimension_semantics<parallel>], iteration_bounds = array<i64: 1, 3>, scalar_prefetch = 0 : i64, scratch_operands = 0 : i64, tpu.core_type = #tpu.core_type<tc>, window_params = [{transform_indices = @transform_0, window_bounds = array<i64: 64, 128>}, {transform_indices = @transform_1, window_bounds = array<i64: 128, 256>}, {transform_indices = @transform_2, window_bounds = array<i64: 1, 256>}, {transform_indices = @transform_3, window_bounds = array<i64: 64, 256>}]} {
    %c0 = arith.constant 0 : index
    %c0_0 = arith.constant 0 : index
    %0 = vector.load %arg2[%c0, %c0_0] : memref<64x128xbf16, #tpu.memory_space<vmem>>, vector<64x128xbf16>
    %c0_1 = arith.constant 0 : index
    %c0_2 = arith.constant 0 : index
    %1 = vector.load %arg3[%c0_1, %c0_2] : memref<128x256xbf16, #tpu.memory_space<vmem>>, vector<128x256xbf16>
    %cst = arith.constant dense<0.000000e+00> : vector<64x256xf32>
    %2 = tpu.matmul %0, %1, %cst {dimension_numbers = #tpu.dot_dimension_numbers<[1], [0], [0], [1], [0, 0, 1, 1], [], []>} : vector<64x128xbf16>, vector<128x256xbf16>, vector<64x256xf32> -> vector<64x256xf32>
    %c0_3 = arith.constant 0 : index
    %c0_4 = arith.constant 0 : index
    %3 = vector.load %arg4[%c0_3, %c0_4] : memref<1x256xf32, #tpu.memory_space<vmem>>, vector<1x256xf32>
    %4 = vector.broadcast %3 : vector<1x256xf32> to vector<64x256xf32>
    %5 = arith.addf %2, %4 : vector<64x256xf32>
    %6 = arith.truncf %5 : vector<64x256xf32> to vector<64x256xbf16>
    %c0_5 = arith.constant 0 : index
    %c0_6 = arith.constant 0 : index
    %7 = vector.load %arg5[%c0_5, %c0_6] : memref<64x256xbf16, #tpu.memory_space<vmem>>, vector<64x256xbf16>
    tpu.vector_store %arg5[%c0_5, %c0_6], %6 {strides = array<i32>} : memref<64x256xbf16, #tpu.memory_space<vmem>>, vector<64x256xbf16>,
    return
  }
  func.func @transform_0(%arg0: i32, %arg1: i32) -> (i32, i32) {
    %c0_i32 = arith.constant 0 : i32
    %c0_i32_0 = arith.constant 0 : i32
    return %arg0, %c0_i32 : i32, i32
  }
  func.func @transform_1(%arg0: i32, %arg1: i32) -> (i32, i32) {
    %c0_i32 = arith.constant 0 : i32
    %c0_i32_0 = arith.constant 0 : i32
    return %c0_i32, %arg1 : i32, i32
  }
  func.func @transform_2(%arg0: i32, %arg1: i32) -> (i32, i32) {
    %c0_i32 = arith.constant 0 : i32
    %c0_i32_0 = arith.constant 0 : i32
    return %c0_i32, %arg1 : i32, i32
  }
  func.func @transform_3(%arg0: i32, %arg1: i32) -> (i32, i32) {
    %c0_i32 = arith.constant 0 : i32
    return %arg0, %arg1 : i32, i32
  }
}

module attributes {stable_mosaic.version = 11 : i64} {
  func.func @_gru_chunk_kernel(%arg0: i32, %arg1: i32, %arg2: memref<8x8x384xbf16, #tpu.memory_space<vmem>>, %arg3: memref<1x128x384xbf16, #tpu.memory_space<vmem>>, %arg4: memref<1x1x384xf32, #tpu.memory_space<vmem>>, %arg5: memref<8x8x128xbf16, #tpu.memory_space<vmem>>, %arg6: memref<8x128xf32, #tpu.memory_space<vmem>>) attributes {dimension_semantics = [#tpu.dimension_semantics<parallel>, #tpu.dimension_semantics<arbitrary>], iteration_bounds = array<i64: 2, 1>, scalar_prefetch = 0 : i64, scratch_operands = 1 : i64, tpu.core_type = #tpu.core_type<tc>, window_params = [{transform_indices = @transform_0, window_bounds = array<i64: 8, 8, 384>}, {transform_indices = @transform_1, window_bounds = array<i64: 1, 128, 384>}, {transform_indices = @transform_2, window_bounds = array<i64: 1, 1, 384>}, {transform_indices = @transform_3, window_bounds = array<i64: 8, 8, 128>}]} {
    %c1_i32 = arith.constant 1 : i32
    %0 = arith.cmpi eq, %arg0, %c1_i32 : i32
    %c0_i32 = arith.constant 0 : i32
    %1 = arith.cmpi eq, %arg1, %c0_i32 : i32
    %2 = arith.extui %1 : i1 to i32
    %c0_i32_0 = arith.constant 0 : i32
    %3 = arith.cmpi ne, %2, %c0_i32_0 : i32
    scf.if %3 {
      %cst = arith.constant 0.000000e+00 : f32
      %17 = vector.broadcast %cst : f32 to vector<8x128xf32>
      %c0_14 = arith.constant 0 : index
      %c0_15 = arith.constant 0 : index
      %18 = vector.load %arg6[%c0_14, %c0_15] : memref<8x128xf32, #tpu.memory_space<vmem>>, vector<8x128xf32>
      tpu.vector_store %arg6[%c0_14, %c0_15], %17 {strides = array<i32>} : memref<8x128xf32, #tpu.memory_space<vmem>>, vector<8x128xf32>,
    } else {
    }
    %c0 = arith.constant 0 : index
    %c0_1 = arith.constant 0 : index
    %c0_2 = arith.constant 0 : index
    %4 = vector.load %arg3[%c0, %c0_1, %c0_2] : memref<1x128x384xbf16, #tpu.memory_space<vmem>>, vector<1x128x384xbf16>
    %5 = vector.shape_cast %4 : vector<1x128x384xbf16> to vector<128x384xbf16>
    %c0_3 = arith.constant 0 : index
    %c0_4 = arith.constant 0 : index
    %c0_5 = arith.constant 0 : index
    %6 = vector.load %arg4[%c0_3, %c0_4, %c0_5] : memref<1x1x384xf32, #tpu.memory_space<vmem>>, vector<1x1x384xf32>
    %7 = vector.shape_cast %6 : vector<1x1x384xf32> to vector<1x384xf32>
    %8 = vector.shape_cast %7 : vector<1x384xf32> to vector<1x384xf32>
    %9 = vector.broadcast %8 : vector<1x384xf32> to vector<8x384xf32>
    %c0_i32_6 = arith.constant 0 : i32
    %10 = arith.subi %c0_i32_6, %arg1 : i32
    %11 = arith.select %0, %10, %arg1 : i32
    %c8_i32 = arith.constant 8 : i32
    %12 = arith.muli %11, %c8_i32 : i32
    %c0_7 = arith.constant 0 : index
    %c0_8 = arith.constant 0 : index
    %13 = vector.load %arg6[%c0_7, %c0_8] : memref<8x128xf32, #tpu.memory_space<vmem>>, vector<8x128xf32>
    %c0_i32_9 = arith.constant 0 : i32
    %c2_i32 = arith.constant 2 : i32
    %14 = arith.addi %c0_i32_9, %c2_i32 : i32
    %c1_i32_10 = arith.constant 1 : i32
    %15 = scf.for %arg7 = %c0_i32_9 to %14 step %c1_i32_10 iter_args(%arg8 = %13) -> (vector<8x128xf32>)  : i32 {
      %c4_i32 = arith.constant 4 : i32
      %17 = arith.muli %arg7, %c4_i32 : i32
      %c0_i32_14 = arith.constant 0 : i32
      %18 = arith.addi %17, %c0_i32_14 : i32
      %c7_i32 = arith.constant 7 : i32
      %19 = arith.subi %c7_i32, %18 : i32
      %20 = arith.select %0, %19, %18 : i32
      %21 = arith.index_cast %20 : i32 to index
      %c0_15 = arith.constant 0 : index
      %c0_16 = arith.constant 0 : index
      %22 = vector.load %arg2[%21, %c0_15, %c0_16] : memref<8x8x384xbf16, #tpu.memory_space<vmem>>, vector<1x8x384xbf16>
      %23 = vector.shape_cast %22 : vector<1x8x384xbf16> to vector<8x384xbf16>
      %24 = arith.extf %23 : vector<8x384xbf16> to vector<8x384xf32>
      %25 = arith.truncf %arg8 : vector<8x128xf32> to vector<8x128xbf16>
      %cst = arith.constant dense<0.000000e+00> : vector<8x384xf32>
      %26 = tpu.matmul %25, %5, %cst {dimension_numbers = #tpu.dot_dimension_numbers<[1], [0], [0], [1], [0, 0, 1, 1], [], []>} : vector<8x128xbf16>, vector<128x384xbf16>, vector<8x384xf32> -> vector<8x384xf32>
      %27 = arith.addf %26, %9 : vector<8x384xf32>
      %28 = vector.extract_strided_slice %24 {offsets = [0, 0], sizes = [8, 128], strides = [1, 1]} : vector<8x384xf32> to vector<8x128xf32>
      %29 = vector.extract_strided_slice %27 {offsets = [0, 0], sizes = [8, 128], strides = [1, 1]} : vector<8x384xf32> to vector<8x128xf32>
      %30 = arith.addf %28, %29 : vector<8x128xf32>
      %31 = arith.negf %30 : vector<8x128xf32>
      %32 = math.exp %31 : vector<8x128xf32>
      %cst_17 = arith.constant 1.000000e+00 : f32
      %33 = vector.broadcast %cst_17 : f32 to vector<8x128xf32>
      %34 = arith.addf %33, %32 : vector<8x128xf32>
      %35 = arith.divf %33, %34 : vector<8x128xf32>
      %36 = vector.extract_strided_slice %24 {offsets = [0, 128], sizes = [8, 128], strides = [1, 1]} : vector<8x384xf32> to vector<8x128xf32>
      %37 = vector.extract_strided_slice %27 {offsets = [0, 128], sizes = [8, 128], strides = [1, 1]} : vector<8x384xf32> to vector<8x128xf32>
      %38 = arith.addf %36, %37 : vector<8x128xf32>
      %39 = arith.negf %38 : vector<8x128xf32>
      %40 = math.exp %39 : vector<8x128xf32>
      %cst_18 = arith.constant 1.000000e+00 : f32
      %41 = vector.broadcast %cst_18 : f32 to vector<8x128xf32>
      %42 = arith.addf %41, %40 : vector<8x128xf32>
      %43 = arith.divf %41, %42 : vector<8x128xf32>
      %44 = vector.extract_strided_slice %24 {offsets = [0, 256], sizes = [8, 128], strides = [1, 1]} : vector<8x384xf32> to vector<8x128xf32>
      %45 = vector.extract_strided_slice %27 {offsets = [0, 256], sizes = [8, 128], strides = [1, 1]} : vector<8x384xf32> to vector<8x128xf32>
      %46 = arith.mulf %35, %45 : vector<8x128xf32>
      %47 = arith.addf %44, %46 : vector<8x128xf32>
      %48 = math.tanh %47 : vector<8x128xf32>
      %cst_19 = arith.constant 1.000000e+00 : f32
      %49 = vector.broadcast %cst_19 : f32 to vector<8x128xf32>
      %50 = arith.subf %49, %43 : vector<8x128xf32>
      %51 = arith.mulf %50, %48 : vector<8x128xf32>
      %52 = arith.mulf %43, %arg8 : vector<8x128xf32>
      %53 = arith.addf %51, %52 : vector<8x128xf32>
      %54 = arith.addi %12, %20 : i32
      %c7_i32_20 = arith.constant 7 : i32
      %55 = arith.cmpi slt, %54, %c7_i32_20 : i32
      %56 = arith.select %55, %53, %arg8 : vector<8x128xf32>
      %57 = arith.truncf %56 : vector<8x128xf32> to vector<8x128xbf16>
      %58 = arith.index_cast %20 : i32 to index
      %c0_21 = arith.constant 0 : index
      %c0_22 = arith.constant 0 : index
      %59 = vector.load %arg5[%58, %c0_21, %c0_22] : memref<8x8x128xbf16, #tpu.memory_space<vmem>>, vector<1x8x128xbf16>
      %60 = vector.shape_cast %59 : vector<1x8x128xbf16> to vector<8x128xbf16>
      %61 = vector.shape_cast %57 : vector<8x128xbf16> to vector<1x8x128xbf16>
      tpu.vector_store %arg5[%58, %c0_21, %c0_22], %61 {strides = array<i32>} : memref<8x8x128xbf16, #tpu.memory_space<vmem>>, vector<1x8x128xbf16>,
      %c4_i32_23 = arith.constant 4 : i32
      %62 = arith.muli %arg7, %c4_i32_23 : i32
      %c1_i32_24 = arith.constant 1 : i32
      %63 = arith.addi %62, %c1_i32_24 : i32
      %c7_i32_25 = arith.constant 7 : i32
      %64 = arith.subi %c7_i32_25, %63 : i32
      %65 = arith.select %0, %64, %63 : i32
      %66 = arith.index_cast %65 : i32 to index
      %c0_26 = arith.constant 0 : index
      %c0_27 = arith.constant 0 : index
      %67 = vector.load %arg2[%66, %c0_26, %c0_27] : memref<8x8x384xbf16, #tpu.memory_space<vmem>>, vector<1x8x384xbf16>
      %68 = vector.shape_cast %67 : vector<1x8x384xbf16> to vector<8x384xbf16>
      %69 = arith.extf %68 : vector<8x384xbf16> to vector<8x384xf32>
      %70 = arith.truncf %56 : vector<8x128xf32> to vector<8x128xbf16>
      %cst_28 = arith.constant dense<0.000000e+00> : vector<8x384xf32>
      %71 = tpu.matmul %70, %5, %cst_28 {dimension_numbers = #tpu.dot_dimension_numbers<[1], [0], [0], [1], [0, 0, 1, 1], [], []>} : vector<8x128xbf16>, vector<128x384xbf16>, vector<8x384xf32> -> vector<8x384xf32>
      %72 = arith.addf %71, %9 : vector<8x384xf32>
      %73 = vector.extract_strided_slice %69 {offsets = [0, 0], sizes = [8, 128], strides = [1, 1]} : vector<8x384xf32> to vector<8x128xf32>
      %74 = vector.extract_strided_slice %72 {offsets = [0, 0], sizes = [8, 128], strides = [1, 1]} : vector<8x384xf32> to vector<8x128xf32>
      %75 = arith.addf %73, %74 : vector<8x128xf32>
      %76 = arith.negf %75 : vector<8x128xf32>
      %77 = math.exp %76 : vector<8x128xf32>
      %cst_29 = arith.constant 1.000000e+00 : f32
      %78 = vector.broadcast %cst_29 : f32 to vector<8x128xf32>
      %79 = arith.addf %78, %77 : vector<8x128xf32>
      %80 = arith.divf %78, %79 : vector<8x128xf32>
      %81 = vector.extract_strided_slice %69 {offsets = [0, 128], sizes = [8, 128], strides = [1, 1]} : vector<8x384xf32> to vector<8x128xf32>
      %82 = vector.extract_strided_slice %72 {offsets = [0, 128], sizes = [8, 128], strides = [1, 1]} : vector<8x384xf32> to vector<8x128xf32>
      %83 = arith.addf %81, %82 : vector<8x128xf32>
      %84 = arith.negf %83 : vector<8x128xf32>
      %85 = math.exp %84 : vector<8x128xf32>
      %cst_30 = arith.constant 1.000000e+00 : f32
      %86 = vector.broadcast %cst_30 : f32 to vector<8x128xf32>
      %87 = arith.addf %86, %85 : vector<8x128xf32>
      %88 = arith.divf %86, %87 : vector<8x128xf32>
      %89 = vector.extract_strided_slice %69 {offsets = [0, 256], sizes = [8, 128], strides = [1, 1]} : vector<8x384xf32> to vector<8x128xf32>
      %90 = vector.extract_strided_slice %72 {offsets = [0, 256], sizes = [8, 128], strides = [1, 1]} : vector<8x384xf32> to vector<8x128xf32>
      %91 = arith.mulf %80, %90 : vector<8x128xf32>
      %92 = arith.addf %89, %91 : vector<8x128xf32>
      %93 = math.tanh %92 : vector<8x128xf32>
      %cst_31 = arith.constant 1.000000e+00 : f32
      %94 = vector.broadcast %cst_31 : f32 to vector<8x128xf32>
      %95 = arith.subf %94, %88 : vector<8x128xf32>
      %96 = arith.mulf %95, %93 : vector<8x128xf32>
      %97 = arith.mulf %88, %56 : vector<8x128xf32>
      %98 = arith.addf %96, %97 : vector<8x128xf32>
      %99 = arith.addi %12, %65 : i32
      %c7_i32_32 = arith.constant 7 : i32
      %100 = arith.cmpi slt, %99, %c7_i32_32 : i32
      %101 = arith.select %100, %98, %56 : vector<8x128xf32>
      %102 = arith.truncf %101 : vector<8x128xf32> to vector<8x128xbf16>
      %103 = arith.index_cast %65 : i32 to index
      %c0_33 = arith.constant 0 : index
      %c0_34 = arith.constant 0 : index
      %104 = vector.load %arg5[%103, %c0_33, %c0_34] : memref<8x8x128xbf16, #tpu.memory_space<vmem>>, vector<1x8x128xbf16>
      %105 = vector.shape_cast %104 : vector<1x8x128xbf16> to vector<8x128xbf16>
      %106 = vector.shape_cast %102 : vector<8x128xbf16> to vector<1x8x128xbf16>
      tpu.vector_store %arg5[%103, %c0_33, %c0_34], %106 {strides = array<i32>} : memref<8x8x128xbf16, #tpu.memory_space<vmem>>, vector<1x8x128xbf16>,
      %c4_i32_35 = arith.constant 4 : i32
      %107 = arith.muli %arg7, %c4_i32_35 : i32
      %c2_i32_36 = arith.constant 2 : i32
      %108 = arith.addi %107, %c2_i32_36 : i32
      %c7_i32_37 = arith.constant 7 : i32
      %109 = arith.subi %c7_i32_37, %108 : i32
      %110 = arith.select %0, %109, %108 : i32
      %111 = arith.index_cast %110 : i32 to index
      %c0_38 = arith.constant 0 : index
      %c0_39 = arith.constant 0 : index
      %112 = vector.load %arg2[%111, %c0_38, %c0_39] : memref<8x8x384xbf16, #tpu.memory_space<vmem>>, vector<1x8x384xbf16>
      %113 = vector.shape_cast %112 : vector<1x8x384xbf16> to vector<8x384xbf16>
      %114 = arith.extf %113 : vector<8x384xbf16> to vector<8x384xf32>
      %115 = arith.truncf %101 : vector<8x128xf32> to vector<8x128xbf16>
      %cst_40 = arith.constant dense<0.000000e+00> : vector<8x384xf32>
      %116 = tpu.matmul %115, %5, %cst_40 {dimension_numbers = #tpu.dot_dimension_numbers<[1], [0], [0], [1], [0, 0, 1, 1], [], []>} : vector<8x128xbf16>, vector<128x384xbf16>, vector<8x384xf32> -> vector<8x384xf32>
      %117 = arith.addf %116, %9 : vector<8x384xf32>
      %118 = vector.extract_strided_slice %114 {offsets = [0, 0], sizes = [8, 128], strides = [1, 1]} : vector<8x384xf32> to vector<8x128xf32>
      %119 = vector.extract_strided_slice %117 {offsets = [0, 0], sizes = [8, 128], strides = [1, 1]} : vector<8x384xf32> to vector<8x128xf32>
      %120 = arith.addf %118, %119 : vector<8x128xf32>
      %121 = arith.negf %120 : vector<8x128xf32>
      %122 = math.exp %121 : vector<8x128xf32>
      %cst_41 = arith.constant 1.000000e+00 : f32
      %123 = vector.broadcast %cst_41 : f32 to vector<8x128xf32>
      %124 = arith.addf %123, %122 : vector<8x128xf32>
      %125 = arith.divf %123, %124 : vector<8x128xf32>
      %126 = vector.extract_strided_slice %114 {offsets = [0, 128], sizes = [8, 128], strides = [1, 1]} : vector<8x384xf32> to vector<8x128xf32>
      %127 = vector.extract_strided_slice %117 {offsets = [0, 128], sizes = [8, 128], strides = [1, 1]} : vector<8x384xf32> to vector<8x128xf32>
      %128 = arith.addf %126, %127 : vector<8x128xf32>
      %129 = arith.negf %128 : vector<8x128xf32>
      %130 = math.exp %129 : vector<8x128xf32>
      %cst_42 = arith.constant 1.000000e+00 : f32
      %131 = vector.broadcast %cst_42 : f32 to vector<8x128xf32>
      %132 = arith.addf %131, %130 : vector<8x128xf32>
      %133 = arith.divf %131, %132 : vector<8x128xf32>
      %134 = vector.extract_strided_slice %114 {offsets = [0, 256], sizes = [8, 128], strides = [1, 1]} : vector<8x384xf32> to vector<8x128xf32>
      %135 = vector.extract_strided_slice %117 {offsets = [0, 256], sizes = [8, 128], strides = [1, 1]} : vector<8x384xf32> to vector<8x128xf32>
      %136 = arith.mulf %125, %135 : vector<8x128xf32>
      %137 = arith.addf %134, %136 : vector<8x128xf32>
      %138 = math.tanh %137 : vector<8x128xf32>
      %cst_43 = arith.constant 1.000000e+00 : f32
      %139 = vector.broadcast %cst_43 : f32 to vector<8x128xf32>
      %140 = arith.subf %139, %133 : vector<8x128xf32>
      %141 = arith.mulf %140, %138 : vector<8x128xf32>
      %142 = arith.mulf %133, %101 : vector<8x128xf32>
      %143 = arith.addf %141, %142 : vector<8x128xf32>
      %144 = arith.addi %12, %110 : i32
      %c7_i32_44 = arith.constant 7 : i32
      %145 = arith.cmpi slt, %144, %c7_i32_44 : i32
      %146 = arith.select %145, %143, %101 : vector<8x128xf32>
      %147 = arith.truncf %146 : vector<8x128xf32> to vector<8x128xbf16>
      %148 = arith.index_cast %110 : i32 to index
      %c0_45 = arith.constant 0 : index
      %c0_46 = arith.constant 0 : index
      %149 = vector.load %arg5[%148, %c0_45, %c0_46] : memref<8x8x128xbf16, #tpu.memory_space<vmem>>, vector<1x8x128xbf16>
      %150 = vector.shape_cast %149 : vector<1x8x128xbf16> to vector<8x128xbf16>
      %151 = vector.shape_cast %147 : vector<8x128xbf16> to vector<1x8x128xbf16>
      tpu.vector_store %arg5[%148, %c0_45, %c0_46], %151 {strides = array<i32>} : memref<8x8x128xbf16, #tpu.memory_space<vmem>>, vector<1x8x128xbf16>,
      %c4_i32_47 = arith.constant 4 : i32
      %152 = arith.muli %arg7, %c4_i32_47 : i32
      %c3_i32 = arith.constant 3 : i32
      %153 = arith.addi %152, %c3_i32 : i32
      %c7_i32_48 = arith.constant 7 : i32
      %154 = arith.subi %c7_i32_48, %153 : i32
      %155 = arith.select %0, %154, %153 : i32
      %156 = arith.index_cast %155 : i32 to index
      %c0_49 = arith.constant 0 : index
      %c0_50 = arith.constant 0 : index
      %157 = vector.load %arg2[%156, %c0_49, %c0_50] : memref<8x8x384xbf16, #tpu.memory_space<vmem>>, vector<1x8x384xbf16>
      %158 = vector.shape_cast %157 : vector<1x8x384xbf16> to vector<8x384xbf16>
      %159 = arith.extf %158 : vector<8x384xbf16> to vector<8x384xf32>
      %160 = arith.truncf %146 : vector<8x128xf32> to vector<8x128xbf16>
      %cst_51 = arith.constant dense<0.000000e+00> : vector<8x384xf32>
      %161 = tpu.matmul %160, %5, %cst_51 {dimension_numbers = #tpu.dot_dimension_numbers<[1], [0], [0], [1], [0, 0, 1, 1], [], []>} : vector<8x128xbf16>, vector<128x384xbf16>, vector<8x384xf32> -> vector<8x384xf32>
      %162 = arith.addf %161, %9 : vector<8x384xf32>
      %163 = vector.extract_strided_slice %159 {offsets = [0, 0], sizes = [8, 128], strides = [1, 1]} : vector<8x384xf32> to vector<8x128xf32>
      %164 = vector.extract_strided_slice %162 {offsets = [0, 0], sizes = [8, 128], strides = [1, 1]} : vector<8x384xf32> to vector<8x128xf32>
      %165 = arith.addf %163, %164 : vector<8x128xf32>
      %166 = arith.negf %165 : vector<8x128xf32>
      %167 = math.exp %166 : vector<8x128xf32>
      %cst_52 = arith.constant 1.000000e+00 : f32
      %168 = vector.broadcast %cst_52 : f32 to vector<8x128xf32>
      %169 = arith.addf %168, %167 : vector<8x128xf32>
      %170 = arith.divf %168, %169 : vector<8x128xf32>
      %171 = vector.extract_strided_slice %159 {offsets = [0, 128], sizes = [8, 128], strides = [1, 1]} : vector<8x384xf32> to vector<8x128xf32>
      %172 = vector.extract_strided_slice %162 {offsets = [0, 128], sizes = [8, 128], strides = [1, 1]} : vector<8x384xf32> to vector<8x128xf32>
      %173 = arith.addf %171, %172 : vector<8x128xf32>
      %174 = arith.negf %173 : vector<8x128xf32>
      %175 = math.exp %174 : vector<8x128xf32>
      %cst_53 = arith.constant 1.000000e+00 : f32
      %176 = vector.broadcast %cst_53 : f32 to vector<8x128xf32>
      %177 = arith.addf %176, %175 : vector<8x128xf32>
      %178 = arith.divf %176, %177 : vector<8x128xf32>
      %179 = vector.extract_strided_slice %159 {offsets = [0, 256], sizes = [8, 128], strides = [1, 1]} : vector<8x384xf32> to vector<8x128xf32>
      %180 = vector.extract_strided_slice %162 {offsets = [0, 256], sizes = [8, 128], strides = [1, 1]} : vector<8x384xf32> to vector<8x128xf32>
      %181 = arith.mulf %170, %180 : vector<8x128xf32>
      %182 = arith.addf %179, %181 : vector<8x128xf32>
      %183 = math.tanh %182 : vector<8x128xf32>
      %cst_54 = arith.constant 1.000000e+00 : f32
      %184 = vector.broadcast %cst_54 : f32 to vector<8x128xf32>
      %185 = arith.subf %184, %178 : vector<8x128xf32>
      %186 = arith.mulf %185, %183 : vector<8x128xf32>
      %187 = arith.mulf %178, %146 : vector<8x128xf32>
      %188 = arith.addf %186, %187 : vector<8x128xf32>
      %189 = arith.addi %12, %155 : i32
      %c7_i32_55 = arith.constant 7 : i32
      %190 = arith.cmpi slt, %189, %c7_i32_55 : i32
      %191 = arith.select %190, %188, %146 : vector<8x128xf32>
      %192 = arith.truncf %191 : vector<8x128xf32> to vector<8x128xbf16>
      %193 = arith.index_cast %155 : i32 to index
      %c0_56 = arith.constant 0 : index
      %c0_57 = arith.constant 0 : index
      %194 = vector.load %arg5[%193, %c0_56, %c0_57] : memref<8x8x128xbf16, #tpu.memory_space<vmem>>, vector<1x8x128xbf16>
      %195 = vector.shape_cast %194 : vector<1x8x128xbf16> to vector<8x128xbf16>
      %196 = vector.shape_cast %192 : vector<8x128xbf16> to vector<1x8x128xbf16>
      tpu.vector_store %arg5[%193, %c0_56, %c0_57], %196 {strides = array<i32>} : memref<8x8x128xbf16, #tpu.memory_space<vmem>>, vector<1x8x128xbf16>,
      scf.yield %191 : vector<8x128xf32>
    }
    %c2_i32_11 = arith.constant 2 : i32
    %c0_12 = arith.constant 0 : index
    %c0_13 = arith.constant 0 : index
    %16 = vector.load %arg6[%c0_12, %c0_13] : memref<8x128xf32, #tpu.memory_space<vmem>>, vector<8x128xf32>
    tpu.vector_store %arg6[%c0_12, %c0_13], %15 {strides = array<i32>} : memref<8x128xf32, #tpu.memory_space<vmem>>, vector<8x128xf32>,
    return
  }
  func.func @transform_0(%arg0: i32, %arg1: i32) -> (i32, i32, i32) {
    %c2_i32 = arith.constant 2 : i32
    %0 = arith.muli %c2_i32, %arg1 : i32
    %c0_i32 = arith.constant 0 : i32
    %1 = arith.subi %c0_i32, %0 : i32
    %2 = arith.muli %arg0, %1 : i32
    %3 = arith.addi %arg1, %2 : i32
    %c0_i32_0 = arith.constant 0 : i32
    %c0_i32_1 = arith.constant 0 : i32
    return %3, %c0_i32_0, %arg0 : i32, i32, i32
  }
  func.func @transform_1(%arg0: i32, %arg1: i32) -> (i32, i32, i32) {
    %c0_i32 = arith.constant 0 : i32
    %c0_i32_0 = arith.constant 0 : i32
    %c0_i32_1 = arith.constant 0 : i32
    return %arg0, %c0_i32, %c0_i32_0 : i32, i32, i32
  }
  func.func @transform_2(%arg0: i32, %arg1: i32) -> (i32, i32, i32) {
    %c0_i32 = arith.constant 0 : i32
    %c0_i32_0 = arith.constant 0 : i32
    %c0_i32_1 = arith.constant 0 : i32
    return %arg0, %c0_i32, %c0_i32_0 : i32, i32, i32
  }
  func.func @transform_3(%arg0: i32, %arg1: i32) -> (i32, i32, i32) {
    %c2_i32 = arith.constant 2 : i32
    %0 = arith.muli %c2_i32, %arg1 : i32
    %c0_i32 = arith.constant 0 : i32
    %1 = arith.subi %c0_i32, %0 : i32
    %2 = arith.muli %arg0, %1 : i32
    %3 = arith.addi %arg1, %2 : i32
    %c0_i32_0 = arith.constant 0 : i32
    %c0_i32_1 = arith.constant 0 : i32
    return %3, %c0_i32_0, %arg0 : i32, i32, i32
  }
}

module attributes {stable_mosaic.version = 11 : i64} {
  func.func @_linear_kernel(%arg0: i32, %arg1: i32, %arg2: memref<64x256xbf16, #tpu.memory_space<vmem>>, %arg3: memref<256x256xbf16, #tpu.memory_space<vmem>>, %arg4: memref<1x256xf32, #tpu.memory_space<vmem>>, %arg5: memref<64x256xbf16, #tpu.memory_space<vmem>>) attributes {dimension_semantics = [#tpu.dimension_semantics<parallel>, #tpu.dimension_semantics<parallel>], iteration_bounds = array<i64: 1, 3>, scalar_prefetch = 0 : i64, scratch_operands = 0 : i64, tpu.core_type = #tpu.core_type<tc>, window_params = [{transform_indices = @transform_0, window_bounds = array<i64: 64, 256>}, {transform_indices = @transform_1, window_bounds = array<i64: 256, 256>}, {transform_indices = @transform_2, window_bounds = array<i64: 1, 256>}, {transform_indices = @transform_3, window_bounds = array<i64: 64, 256>}]} {
    %c0 = arith.constant 0 : index
    %c0_0 = arith.constant 0 : index
    %0 = vector.load %arg2[%c0, %c0_0] : memref<64x256xbf16, #tpu.memory_space<vmem>>, vector<64x256xbf16>
    %c0_1 = arith.constant 0 : index
    %c0_2 = arith.constant 0 : index
    %1 = vector.load %arg3[%c0_1, %c0_2] : memref<256x256xbf16, #tpu.memory_space<vmem>>, vector<256x256xbf16>
    %cst = arith.constant dense<0.000000e+00> : vector<64x256xf32>
    %2 = tpu.matmul %0, %1, %cst {dimension_numbers = #tpu.dot_dimension_numbers<[1], [0], [0], [1], [0, 0, 1, 1], [], []>} : vector<64x256xbf16>, vector<256x256xbf16>, vector<64x256xf32> -> vector<64x256xf32>
    %c0_3 = arith.constant 0 : index
    %c0_4 = arith.constant 0 : index
    %3 = vector.load %arg4[%c0_3, %c0_4] : memref<1x256xf32, #tpu.memory_space<vmem>>, vector<1x256xf32>
    %4 = vector.broadcast %3 : vector<1x256xf32> to vector<64x256xf32>
    %5 = arith.addf %2, %4 : vector<64x256xf32>
    %6 = arith.truncf %5 : vector<64x256xf32> to vector<64x256xbf16>
    %c0_5 = arith.constant 0 : index
    %c0_6 = arith.constant 0 : index
    %7 = vector.load %arg5[%c0_5, %c0_6] : memref<64x256xbf16, #tpu.memory_space<vmem>>, vector<64x256xbf16>
    tpu.vector_store %arg5[%c0_5, %c0_6], %6 {strides = array<i32>} : memref<64x256xbf16, #tpu.memory_space<vmem>>, vector<64x256xbf16>,
    return
  }
  func.func @transform_0(%arg0: i32, %arg1: i32) -> (i32, i32) {
    %c0_i32 = arith.constant 0 : i32
    %c0_i32_0 = arith.constant 0 : i32
    return %arg0, %c0_i32 : i32, i32
  }
  func.func @transform_1(%arg0: i32, %arg1: i32) -> (i32, i32) {
    %c0_i32 = arith.constant 0 : i32
    %c0_i32_0 = arith.constant 0 : i32
    return %c0_i32, %arg1 : i32, i32
  }
  func.func @transform_2(%arg0: i32, %arg1: i32) -> (i32, i32) {
    %c0_i32 = arith.constant 0 : i32
    %c0_i32_0 = arith.constant 0 : i32
    return %c0_i32, %arg1 : i32, i32
  }
  func.func @transform_3(%arg0: i32, %arg1: i32) -> (i32, i32) {
    %c0_i32 = arith.constant 0 : i32
    return %arg0, %arg1 : i32, i32
  }
}

module attributes {stable_mosaic.version = 11 : i64} {
  func.func @_linear_kernel(%arg0: i32, %arg1: i32, %arg2: memref<64x256xbf16, #tpu.memory_space<vmem>>, %arg3: memref<256x128xbf16, #tpu.memory_space<vmem>>, %arg4: memref<1x128xf32, #tpu.memory_space<vmem>>, %arg5: memref<64x128xf32, #tpu.memory_space<vmem>>) attributes {dimension_semantics = [#tpu.dimension_semantics<parallel>, #tpu.dimension_semantics<parallel>], iteration_bounds = array<i64: 1, 1>, scalar_prefetch = 0 : i64, scratch_operands = 0 : i64, tpu.core_type = #tpu.core_type<tc>, window_params = [{transform_indices = @transform_0, window_bounds = array<i64: 64, 256>}, {transform_indices = @transform_1, window_bounds = array<i64: 256, 128>}, {transform_indices = @transform_2, window_bounds = array<i64: 1, 128>}, {transform_indices = @transform_3, window_bounds = array<i64: 64, 128>}]} {
    %c0 = arith.constant 0 : index
    %c0_0 = arith.constant 0 : index
    %0 = vector.load %arg2[%c0, %c0_0] : memref<64x256xbf16, #tpu.memory_space<vmem>>, vector<64x256xbf16>
    %c0_1 = arith.constant 0 : index
    %c0_2 = arith.constant 0 : index
    %1 = vector.load %arg3[%c0_1, %c0_2] : memref<256x128xbf16, #tpu.memory_space<vmem>>, vector<256x128xbf16>
    %cst = arith.constant dense<0.000000e+00> : vector<64x128xf32>
    %2 = tpu.matmul %0, %1, %cst {dimension_numbers = #tpu.dot_dimension_numbers<[1], [0], [0], [1], [0, 0, 1, 1], [], []>} : vector<64x256xbf16>, vector<256x128xbf16>, vector<64x128xf32> -> vector<64x128xf32>
    %c0_3 = arith.constant 0 : index
    %c0_4 = arith.constant 0 : index
    %3 = vector.load %arg4[%c0_3, %c0_4] : memref<1x128xf32, #tpu.memory_space<vmem>>, vector<1x128xf32>
    %4 = vector.broadcast %3 : vector<1x128xf32> to vector<64x128xf32>
    %5 = arith.addf %2, %4 : vector<64x128xf32>
    %c0_5 = arith.constant 0 : index
    %c0_6 = arith.constant 0 : index
    %6 = vector.load %arg5[%c0_5, %c0_6] : memref<64x128xf32, #tpu.memory_space<vmem>>, vector<64x128xf32>
    tpu.vector_store %arg5[%c0_5, %c0_6], %5 {strides = array<i32>} : memref<64x128xf32, #tpu.memory_space<vmem>>, vector<64x128xf32>,
    return
  }
  func.func @transform_0(%arg0: i32, %arg1: i32) -> (i32, i32) {
    %c0_i32 = arith.constant 0 : i32
    %c0_i32_0 = arith.constant 0 : i32
    return %arg0, %c0_i32 : i32, i32
  }
  func.func @transform_1(%arg0: i32, %arg1: i32) -> (i32, i32) {
    %c0_i32 = arith.constant 0 : i32
    %c0_i32_0 = arith.constant 0 : i32
    return %c0_i32, %arg1 : i32, i32
  }
  func.func @transform_2(%arg0: i32, %arg1: i32) -> (i32, i32) {
    %c0_i32 = arith.constant 0 : i32
    %c0_i32_0 = arith.constant 0 : i32
    return %c0_i32, %arg1 : i32, i32
  }
  func.func @transform_3(%arg0: i32, %arg1: i32) -> (i32, i32) {
    %c0_i32 = arith.constant 0 : i32
    return %arg0, %arg1 : i32, i32
  }
}

</mosaic_0001>

<bundles_post_ra>
// kernel: gru_encoder_forward.6
= control target key start
LH: loop header
LB: loop body
LE: loop exit
PB: predicated region body
PF: predicated region fallthrough
CT: control target
= control target key end

     0   :  { %vm55_vm0 = vcmask 261120   ;;  %s413_s3 = inlined_call_operand.vmem [shape: f32[64,128], index: 3, kind: input, shape index: {}, may-alias: {2,3}]   ;;  %s414_s2 = inlined_call_operand.vmem [shape: f32[64,128], index: 2, kind: input, shape index: {}, may-alias: {2,3}]   ;;  %s415_s1 = inlined_call_operand.vmem [shape: f32[32,32], index: 1, kind: input, shape index: {}]   ;;  %s416_s0 = inlined_call_operand.vmem [shape: f32[32,32], index: 0, kind: input, shape index: {}]   ;;  %s417_s4 = inlined_call_operand.vmem [shape: f32[32,128], index: 4, kind: output, shape index: {}]  }
   0x1   :  { %v267_v0 = vld [vmem:[%s413_s3 + $0x38] sm:$0xff]  ;;  %v266_v2 = vld [vmem:[%s413_s3 + $0x30] sm:$0xff]  ;;  %v265_v4 = vld [vmem:[%s413_s3 + $0x28] sm:$0xff] }
   0x2   :  { %v46_v1 = vld [vmem:[%s414_s2 + $0x18] sm:$0xff]  ;;  %292 = vmatprep.subr.mxu0 %v267_v0  ;;  %v45_v3 = vld [vmem:[%s414_s2 + $0x10] sm:$0xff]  ;;  %v44_v5 = vld [vmem:[%s414_s2 + $0x8] sm:$0xff] }
   0x3   :  { %306 = vmatprep.subr.mxu1 %v46_v1  ;;  %293 = vmatpush3.msra.mxu0 %v267_v0  ;;  %v264_v6 = vld [vmem:[%s413_s3 + $0x20] sm:$0xff]  ;;  %v48_v10 = vld [vmem:[%s415_s1 + $0x8] sm:$0xff]  ;;  %v49_v12 = vld [vmem:[%s415_s1 + $0x10] sm:$0xff] }
   0x4   :  { %307 = vmatpush3.msra.mxu1 %v46_v1  ;;  %294 = vmatprep.subr.mxu0 %v266_v2  ;;  %v43_v7 = vld [vmem:[%s414_s2] sm:$0xff]  ;;  %v40_v11 = vld [vmem:[%s416_s0 + $0x8] sm:$0xff]  ;;  %v41_v13 = vld [vmem:[%s416_s0 + $0x10] sm:$0xff] }
   0x5   :  { %308 = vmatprep.subr.mxu1 %v45_v3  ;;  %295 = vmatpush3.msra.mxu0 %v266_v2  ;;  %v47_v8 = vld [vmem:[%s415_s1] sm:$0xff]  ;;  %v50_v14 = vld [vmem:[%s415_s1 + $0x18] sm:$0xff] }
   0x6   :  { %309 = vmatpush3.msra.mxu1 %v45_v3  ;;  %296 = vmatprep.subr.mxu0 %v265_v4  ;;  %v39_v9 = vld [vmem:[%s416_s0] sm:$0xff]  ;;  %v42_v15 = vld [vmem:[%s416_s0 + $0x18] sm:$0xff] }
   0x7   :  { %310 = vmatprep.subr.mxu1 %v44_v5  ;;  %297 = vmatpush3.msra.mxu0 %v265_v4 }
   0x8   :  { %311 = vmatpush3.msra.mxu1 %v44_v5  ;;  %298 = vmatprep.subr.mxu0 %v264_v6 }
   0x9   :  { %312 = vmatprep.subr.mxu1 %v43_v7  ;;  %299 = vmatpush3.msra.mxu0 %v264_v6 }
   0xa   :  { %300 = vmatprep.mubr.msk.f32.mxu0 %vm55_vm0, %v47_v8  ;;  %313 = vmatpush3.msra.mxu1 %v43_v7 }
   0xb   :  { %314 = vmatprep.mubr.msk.f32.mxu1 %vm55_vm0, %v39_v9  ;;  %301 = vmatmul.mubr.msk.f32.vlgmr.msra.gmra.mxu0 %vm55_vm0, %v48_v10 }
   0xc   :  { %315 = vmatmul.mubr.msk.f32.vlgmr.msra.gmra.mxu1 %vm55_vm0, %v40_v11  ;;  %303 = vmatprep.mubr.msk.f32.mxu0 %vm55_vm0, %v49_v12 }
   0xd   :  { %317 = vmatprep.mubr.msk.f32.mxu1 %vm55_vm0, %v41_v13 }
   0xf   :  { %304 = vmatmul.mubr.msk.f32.gmra.mxu0 %vm55_vm0, %v50_v14 }
  0x10   :  { %318 = vmatmul.mubr.msk.f32.gmra.mxu1 %vm55_vm0, %v42_v15 }
  0xcb   :  { %v302_v16 = vpop.f32.mrf.mxu0 }
  0xcc   :  { %v316_v17 = vpop.f32.mrf.mxu1 }
  0xcd   :  { %v237_v18 = vadd.f32 %v316_v17, %v302_v16  ;;  %v134_v19 = vpop.f32.mrf.mxu0 }
  0xce   :  { %v231_v20 = vpop.f32.mrf.mxu1 }
  0xcf   :  { %251 = vst [vmem:[%s417_s4 + $0x8] sm:$0xff] %v237_v18  ;;  %v232_v21 = vadd.f32 %v231_v20, %v134_v19  ;;  %v305_v22 = vpop.f32.mrf.mxu0 }
  0xd0   :  { %v319_v23 = vpop.f32.mrf.mxu1 }
  0xd1   :  { %250 = vst [vmem:[%s417_s4] sm:$0xff] %v232_v21  ;;  %v247_v24 = vadd.f32 %v319_v23, %v305_v22  ;;  %v144_v25 = vpop.f32.mrf.mxu0 }
  0xd2   :  { %v241_v26 = vpop.f32.mrf.mxu1 }
  0xd3   :  { %253 = vst [vmem:[%s417_s4 + $0x18] sm:$0xff] %v247_v24  ;;  %v242_v27 = vadd.f32 %v241_v26, %v144_v25 }
  0xd5   :  { %252 = vst [vmem:[%s417_s4 + $0x10] sm:$0xff] %v242_v27 }

// kernel: gru_encoder_forward.7
= control target key start
LH: loop header
LB: loop body
LE: loop exit
PB: predicated region body
PF: predicated region fallthrough
CT: control target
= control target key end

     0   :  { %s956_s12 = smov 0   ;;  %s958_s13 = smov 0   ;;  %s1102_s0 = inlined_call_operand.vmem [shape: bf16[64,128], index: 0, kind: input, shape index: {}]   ;;  %s1103_s1 = inlined_call_operand.vmem [shape: bf16[128,768], index: 1, kind: input, shape index: {}]   ;;  %s1104_s2 = inlined_call_operand.vmem [shape: f32[1,768], index: 2, kind: input, shape index: {}]   ;;  %s1105_s3 = inlined_call_operand.vmem [shape: bf16[64,768], index: 3, kind: output, shape index: {}]  }
   0x1   :  { %s960_s14 = smov 0   ;;  %s962_s15 = smov 0  }
   0x2   :  { %s964_s16 = smov 0  }
   0x3 LB: > { %s22_s17 = sadd.s32 1, %s929_s15  ;;  %s755_s18 = sadd.s32 4294967295, %s933_s16   ;;  %s933_s16 = sphi %s964_s16, %s13_s16   ;;  %s929_s15 = sphi %s962_s15, %s1110_s15   ;;  %s925_s14 = sphi %s960_s14, %s1109_s14   ;;  %s921_s13 = sphi %s958_s13, %s1108_s13   ;;  %s917_s12 = sphi %s956_s12, %s1107_s12  }
   0x4   : > { %p23_p0 = scmp.ge.s32.totalorder %s22_s17, 3  ;;  %p65_p1 = scmp.ne.s32.totalorder %s921_s13, %s917_s12 }
   0x5   : > { %p66_p2 = scmp.eq.s32.totalorder %s933_s16, 0  ;;  %p123_p4 = scmp.eq.s32.totalorder %s755_s18, 2 }
   0x6   : > { %s1112_s17 = smov (%p23_p0, %s22_s17), 0  ;;  %s58_s20 = sadd.s32 1, %s921_s13 }
   0x7   : > { %p67_p3 = por %p66_p2, %p65_p1  ;;  %s55_s19 = ssub.s32 %s929_s15, %s1112_s17 }
   0x8   : > { %p56_p5 = scmp.eq.s32.totalorder %s55_s19, 0  ;;  %p991_p6 = por %p123_p4, %p65_p1 }
   0x9   : > { %p759_p7 = scmp.ge.s32.totalorder %s933_s16, 3 }
   0xa   : > { %s996_s22 = scalar_select %p56_p5, %s921_s13, %s58_s20  }
   0xb   : > { %154 = sbr.rel (%p759_p7) target bundleno = 28 (0x1c), region = 20 }
  0x10   : > { %157 = sbr.rel (!%p67_p3) target bundleno = 28 (0x1c), region = 24  ;;  %s159_s23 = sand.u32 (%p67_p3), 1, %s921_s13  }
  0x11   : > { %s800_s24 = sshll.u32 (%p67_p3), %s929_s15, 3  ;;  %s760_s25 = sshll.u32 (%p67_p3), %s159_s23, 7 }
  0x12   : > { %s1004_s28 = scalar_lea.vmem (%p67_p3), %s1103_s1, %s800_s24  ;;  %s161_s29 = scalar_lea.vmem (%p67_p3), [#allocation2], %s760_s25 }
  0x13   : > { %v223_v0 = vld [vmem:[%s1004_s28] sm:$0xff] (%p67_p3)  ;;  %v225_v1 = vld [vmem:[%s1004_s28 + $0x18] sm:$0xff] (%p67_p3)  ;;  %v227_v2 = vld [vmem:[%s1004_s28 + $0x30] sm:$0xff] (%p67_p3) }
  0x14   : > { %224 = vst [vmem:[%s161_s29] sm:$0xff] (%p67_p3), %v223_v0  ;;  %226 = vst [vmem:[%s161_s29 + $0x8] sm:$0xff] (%p67_p3), %v225_v1  ;;  %v229_v3 = vld [vmem:[%s1004_s28 + $0x48] sm:$0xff] (%p67_p3)  ;;  %v231_v4 = vld [vmem:[%s1004_s28 + $0x60] sm:$0xff] (%p67_p3) }
  0x15   : > { %228 = vst [vmem:[%s161_s29 + $0x10] sm:$0xff] %v227_v2  ;;  %v233_v5 = vld [vmem:[%s1004_s28 + $0x78] sm:$0xff]  ;;  %230 = vst [vmem:[%s161_s29 + $0x18] sm:$0xff] %v229_v3  ;;  %v235_v6 = vld [vmem:[%s1004_s28 + $0x90] sm:$0xff] }
  0x16   : > { %232 = vst [vmem:[%s161_s29 + $0x20] sm:$0xff] %v231_v4  ;;  %234 = vst [vmem:[%s161_s29 + $0x28] sm:$0xff] %v233_v5  ;;  %v237_v7 = vld [vmem:[%s1004_s28 + $0xa8] sm:$0xff]  ;;  %v239_v8 = vld [vmem:[%s1004_s28 + $0xc0] sm:$0xff] }
  0x17   : > { %236 = vst [vmem:[%s161_s29 + $0x30] sm:$0xff] %v235_v6  ;;  %238 = vst [vmem:[%s161_s29 + $0x38] sm:$0xff] %v237_v7  ;;  %v241_v9 = vld [vmem:[%s1004_s28 + $0xd8] sm:$0xff]  ;;  %v243_v10 = vld [vmem:[%s1004_s28 + $0xf0] sm:$0xff] }
  0x18   : > { %240 = vst [vmem:[%s161_s29 + $0x40] sm:$0xff] %v239_v8  ;;  %v245_v11 = vld [vmem:[%s1004_s28 + $0x108] sm:$0xff]  ;;  %242 = vst [vmem:[%s161_s29 + $0x48] sm:$0xff] %v241_v9  ;;  %v247_v12 = vld [vmem:[%s1004_s28 + $0x120] sm:$0xff] }
  0x19   : > { %244 = vst [vmem:[%s161_s29 + $0x50] sm:$0xff] %v243_v10  ;;  %246 = vst [vmem:[%s161_s29 + $0x58] sm:$0xff] %v245_v11  ;;  %v249_v13 = vld [vmem:[%s1004_s28 + $0x138] sm:$0xff]  ;;  %v251_v14 = vld [vmem:[%s1004_s28 + $0x150] sm:$0xff] }
  0x1a   : > { %248 = vst [vmem:[%s161_s29 + $0x60] sm:$0xff] %v247_v12  ;;  %250 = vst [vmem:[%s161_s29 + $0x68] sm:$0xff] %v249_v13  ;;  %v253_v15 = vld [vmem:[%s1004_s28 + $0x168] sm:$0xff] }
  0x1b   : > { %252 = vst [vmem:[%s161_s29 + $0x70] sm:$0xff] %v251_v14  ;;  %254 = vst [vmem:[%s161_s29 + $0x78] sm:$0xff] %v253_v15 }
  0x1c PF: > { %p763_p8 = scmp.ge.s32.totalorder %s933_s16, 1  ;;  %p267_p9 = scmp.lt.s32.totalorder %s933_s16, 4 }
  0x1e   : > { %p268_p10 = pnand %p763_p8, %p267_p9 }
  0x1f   : > { %s274_s30 = sand.u32 (!%p268_p10), 1, %s917_s12   ;;  %s766_s20 = sshll.u32 (!%p268_p10), %s925_s14, 1 }
  0x20   : > { %271 = sbr.rel (%p268_p10) target bundleno = 292 (0x124), region = 66  ;;  %s764_s4 = sshll.u32 (!%p268_p10), %s274_s30, 7 }
  0x21   : > { %s1027_s5 = scalar_lea.vmem (!%p268_p10), [#allocation2], %s764_s4  ;;  %p313_p11 = scmp.lt.s32.totalorder (!%p268_p10), %s766_s20, 5 }
  0x22   : > { %s765_s26 = sshll.u32 (!%p268_p10), %s274_s30, 6 }
  0x23   : > { %s1063_s27 = scalar_lea.vmem (!%p268_p10), [#allocation3], %s765_s26 }
  0x25   : > { %v935_v16 = vmov 0   ;;  %v867_v17 = vld [vmem:[%s1027_s5 + $0x74] ss:$8 sps:$4 sm:$0xff]   ;;  %v869_v18 = vld [vmem:[%s1027_s5 + $0x70] ss:$8 sps:$4 sm:$0xff]   ;;  %v891_v33 = vld [vmem:[%s1102_s0] sm:$0xff]   ;;  %v346_v37 = vlaneseq }
  0x26   : > { %492 = vmatprep.mubr.bf16.mxu0 %v935_v16  ;;  %512 = vmatprep.mubr.bf16.mxu1 %v935_v16  ;;  %v870_v19 = vld [vmem:[%s1027_s5 + $0x64] ss:$8 sps:$4 sm:$0xff]   ;;  %v872_v20 = vld [vmem:[%s1027_s5 + $0x60] ss:$8 sps:$4 sm:$0xff]   ;;  %v873_v21 = vld [vmem:[%s1027_s5 + $0x54] ss:$8 sps:$4 sm:$0xff]  }
  0x27   : > { %460 = vmatprep.subr.bf16.mxu0 %v867_v17  ;;  %810 = vmatprep.subr.bf16.mxu1 %v867_v17  ;;  %v875_v22 = vld [vmem:[%s1027_s5 + $0x50] ss:$8 sps:$4 sm:$0xff]   ;;  %v876_v23 = vld [vmem:[%s1027_s5 + $0x44] ss:$8 sps:$4 sm:$0xff]   ;;  %v878_v24 = vld [vmem:[%s1027_s5 + $0x40] ss:$8 sps:$4 sm:$0xff]  }
  0x28   : > { %461 = vmatpush1.bf16.msra.mxu0 %v869_v18  ;;  %818 = vmatpush1.bf16.msra.mxu1 %v869_v18  ;;  %v879_v25 = vld [vmem:[%s1027_s5 + $0x34] ss:$8 sps:$4 sm:$0xff]   ;;  %v881_v26 = vld [vmem:[%s1027_s5 + $0x30] ss:$8 sps:$4 sm:$0xff]   ;;  %v882_v27 = vld [vmem:[%s1027_s5 + $0x24] ss:$8 sps:$4 sm:$0xff]  }
  0x29   : > { %462 = vmatprep.subr.bf16.mxu0 %v870_v19  ;;  %811 = vmatprep.subr.bf16.mxu1 %v870_v19  ;;  %v884_v28 = vld [vmem:[%s1027_s5 + $0x20] ss:$8 sps:$4 sm:$0xff]   ;;  %v885_v29 = vld [vmem:[%s1027_s5 + $0x14] ss:$8 sps:$4 sm:$0xff]   ;;  %v887_v30 = vld [vmem:[%s1027_s5 + $0x10] ss:$8 sps:$4 sm:$0xff]  }
  0x2a   : > { %v888_v31 = vld [vmem:[%s1027_s5 + $0x4] ss:$8 sps:$4 sm:$0xff]   ;;  %v890_v32 = vld [vmem:[%s1027_s5] ss:$8 sps:$4 sm:$0xff]   ;;  %v892_v34 = vld [vmem:[%s1102_s0 + $0x10] sm:$0xff]   ;;  %s1114_s20 = smov (!%p313_p11, %s766_s20), 5 }
  0x2b   : > { %v893_v35 = vld [vmem:[%s1102_s0 + $0x8] sm:$0xff]   ;;  %v894_v36 = vld [vmem:[%s1102_s0 + $0x18] sm:$0xff]   ;;  %v347_v38 = vshrl.u32 %v346_v37, 7  ;;  %s315_s25 = scalar_lea.vmem %s1104_s2, %s1114_s20  ;;  %s809_s12 = sshll.u32 (%p991_p6), %s925_s14, 3 }
  0x2c   : > { %463 = vmatpush1.bf16.msra.mxu0 %v872_v20  ;;  %819 = vmatpush1.bf16.msra.mxu1 %v872_v20  ;;  %v344_v41 = vld [vmem:[%s315_s25] sm:$0x3]  ;;  %s601_s30 = scalar_lea.vmem (%p991_p6), %s1105_s3, %s809_s12 }
  0x2d   : > { %464 = vmatprep.subr.bf16.mxu0 %v873_v21  ;;  %812 = vmatprep.subr.bf16.mxu1 %v873_v21  ;;  %v348_v39 = vsub.s32 0, %v347_v38  ;;  %v352_v40 = vsub.s32 1, %v347_v38 }
  0x2f   : > { %v349_v42 = vrot.slane %v344_v41, %v348_v39  ;;  %v353_v43 = vrot.slane %v344_v41, %v352_v40 }
  0x30   : > { %465 = vmatpush1.bf16.msra.mxu0 %v875_v22  ;;  %820 = vmatpush1.bf16.msra.mxu1 %v875_v22 }
  0x31   : > { %466 = vmatprep.subr.bf16.mxu0 %v876_v23  ;;  %813 = vmatprep.subr.bf16.mxu1 %v876_v23 }
  0x34   : > { %467 = vmatpush1.bf16.msra.mxu0 %v878_v24  ;;  %821 = vmatpush1.bf16.msra.mxu1 %v878_v24 }
  0x35   : > { %468 = vmatprep.subr.bf16.mxu0 %v879_v25  ;;  %814 = vmatprep.subr.bf16.mxu1 %v879_v25 }
  0x38   : > { %469 = vmatpush1.bf16.msra.mxu0 %v881_v26  ;;  %822 = vmatpush1.bf16.msra.mxu1 %v881_v26 }
  0x39   : > { %470 = vmatprep.subr.bf16.mxu0 %v882_v27  ;;  %815 = vmatprep.subr.bf16.mxu1 %v882_v27 }
  0x3c   : > { %471 = vmatpush1.bf16.msra.mxu0 %v884_v28  ;;  %823 = vmatpush1.bf16.msra.mxu1 %v884_v28 }
  0x3d   : > { %472 = vmatprep.subr.bf16.mxu0 %v885_v29  ;;  %816 = vmatprep.subr.bf16.mxu1 %v885_v29 }
  0x40   : > { %473 = vmatpush1.bf16.msra.mxu0 %v887_v30  ;;  %824 = vmatpush1.bf16.msra.mxu1 %v887_v30 }
  0x41   : > { %474 = vmatprep.subr.bf16.mxu0 %v888_v31  ;;  %817 = vmatprep.subr.bf16.mxu1 %v888_v31 }
  0x44   : > { %475 = vmatpush1.bf16.msra.mxu0 %v890_v32  ;;  %825 = vmatpush1.bf16.msra.mxu1 %v890_v32 }
  0x47   : > { %493 = vmatmul.mubr.bf16.vlgmr.msra.gmra.mxu0 %v891_v33  ;;  %513 = vmatmul.mubr.bf16.vlgmr.msra.gmra.mxu1 %v892_v34 }
  0x48   : > { %502 = vmatprep.mubr.bf16.mxu0 %v935_v16  ;;  %522 = vmatprep.mubr.bf16.mxu1 %v935_v16 }
  0x4f   : > { %503 = vmatmul.mubr.bf16.gmra.mxu0 %v893_v35  ;;  %523 = vmatmul.mubr.bf16.gmra.mxu1 %v894_v36 }
 0x107   : > { %v494_v44 = vpop.f32.mrf.mxu0  ;;  %v514_v45 = vpop.f32.mrf.mxu1 }
 0x108   : > { %v495_v48 = vadd.f32 %v494_v44, %v349_v42  ;;  %v515_v49 = vadd.f32 %v514_v45, %v349_v42 }
 0x109   : > { %v496_v46 = vpop.f32.mrf.mxu0  ;;  %v516_v47 = vpop.f32.mrf.mxu1 }
 0x10a   : > { %v497_v50 = vadd.f32 %v496_v46, %v353_v43  ;;  %v517_v51 = vadd.f32 %v516_v47, %v353_v43 }
 0x10b   : > { %v498_v52 = vpop.f32.mrf.mxu0  ;;  %v518_v53 = vpop.f32.mrf.mxu1 }
 0x10c   : > { %v801_v54 = vpack.c.bf16 %v497_v50, %v495_v48  ;;  %v805_v55 = vpack.c.bf16 %v517_v51, %v515_v49  ;;  %v499_v58 = vadd.f32 %v498_v52, %v349_v42  ;;  %v519_v59 = vadd.f32 %v518_v53, %v349_v42 }
 0x10d   : > { %v500_v56 = vpop.f32.mrf.mxu0  ;;  %v520_v57 = vpop.f32.mrf.mxu1 }
 0x10e   : > { %581 = vst [vmem:[%s1063_s27] sm:$0xff] %v801_v54  ;;  %585 = vst [vmem:[%s1063_s27 + $0x20] sm:$0xff] %v805_v55  ;;  %v501_v60 = vadd.f32 %v500_v56, %v353_v43  ;;  %v521_v61 = vadd.f32 %v520_v57, %v353_v43 }
 0x10f   : > { %v504_v62 = vpop.f32.mrf.mxu0  ;;  %v524_v63 = vpop.f32.mrf.mxu1 }
 0x110   : > { %v802_v0 = vpack.c.bf16 %v501_v60, %v499_v58  ;;  %v806_v1 = vpack.c.bf16 %v521_v61, %v519_v59  ;;  %v505_v4 = vadd.f32 %v504_v62, %v349_v42  ;;  %v525_v5 = vadd.f32 %v524_v63, %v349_v42 }
 0x111   : > { %v506_v2 = vpop.f32.mrf.mxu0  ;;  %v526_v3 = vpop.f32.mrf.mxu1 }
 0x112   : > { %582 = vst [vmem:[%s1063_s27 + $0x8] sm:$0xff] %v802_v0  ;;  %586 = vst [vmem:[%s1063_s27 + $0x28] sm:$0xff] %v806_v1  ;;  %v507_v6 = vadd.f32 %v506_v2, %v353_v43  ;;  %v527_v7 = vadd.f32 %v526_v3, %v353_v43 }
 0x113   : > { %v508_v8 = vpop.f32.mrf.mxu0  ;;  %v528_v9 = vpop.f32.mrf.mxu1 }
 0x114   : > { %v803_v10 = vpack.c.bf16 %v507_v6, %v505_v4  ;;  %v807_v11 = vpack.c.bf16 %v527_v7, %v525_v5  ;;  %v509_v14 = vadd.f32 %v508_v8, %v349_v42  ;;  %v529_v15 = vadd.f32 %v528_v9, %v349_v42 }
 0x115   : > { %v510_v12 = vpop.f32.mrf.mxu0  ;;  %v530_v13 = vpop.f32.mrf.mxu1  ;;  %v644_v20 = vld [vmem:[%s1063_s27] sm:$0xff] (%p991_p6) }
 0x116   : > { %583 = vst [vmem:[%s1063_s27 + $0x10] sm:$0xff] %v803_v10  ;;  %587 = vst [vmem:[%s1063_s27 + $0x30] sm:$0xff] %v807_v11  ;;  %v511_v16 = vadd.f32 %v510_v12, %v353_v43  ;;  %v531_v17 = vadd.f32 %v530_v13, %v353_v43  ;;  %595 = sbr.rel (!%p991_p6) target bundleno = 292 (0x124), region = 74  ;;  %v652_v24 = vld [vmem:[%s1063_s27 + $0x20] sm:$0xff] (%p991_p6) }
 0x117   : > { %645 = vst [vmem:[%s601_s30] sm:$0xff] (%p991_p6), %v644_v20  ;;  %653 = vst [vmem:[%s601_s30 + $0x60] sm:$0xff] (%p991_p6), %v652_v24 }
 0x118   : > { %v804_v18 = vpack.c.bf16 %v511_v16, %v509_v14  ;;  %v808_v19 = vpack.c.bf16 %v531_v17, %v529_v15 }
 0x119   : > { %v646_v21 = vld [vmem:[%s1063_s27 + $0x8] sm:$0xff] (%p991_p6) }
 0x11a   : > { %584 = vst [vmem:[%s1063_s27 + $0x18] sm:$0xff] %v804_v18  ;;  %588 = vst [vmem:[%s1063_s27 + $0x38] sm:$0xff] %v808_v19  ;;  %v654_v25 = vld [vmem:[%s1063_s27 + $0x28] sm:$0xff] (%p991_p6) }
 0x11b   : > { %647 = vst [vmem:[%s601_s30 + $0x18] sm:$0xff] %v646_v21  ;;  %655 = vst [vmem:[%s601_s30 + $0x78] sm:$0xff] %v654_v25 }
 0x11d   : > { %v648_v22 = vld [vmem:[%s1063_s27 + $0x10] sm:$0xff] }
 0x11e   : > { %649 = vst [vmem:[%s601_s30 + $0x30] sm:$0xff] %v648_v22  ;;  %v656_v26 = vld [vmem:[%s1063_s27 + $0x30] sm:$0xff] }
 0x11f   : > { %657 = vst [vmem:[%s601_s30 + $0x90] sm:$0xff] %v656_v26 }
 0x121   : > { %v650_v23 = vld [vmem:[%s1063_s27 + $0x18] sm:$0xff] }
 0x122   : > { %651 = vst [vmem:[%s601_s30 + $0x48] sm:$0xff] %v650_v23  ;;  %v658_v27 = vld [vmem:[%s1063_s27 + $0x38] sm:$0xff] }
 0x123   : > { %659 = vst [vmem:[%s601_s30 + $0xa8] sm:$0xff] %v658_v27 }
 0x124 PF: > { %s13_s16 = sadd.s32 1, %s933_s16   ;;  %s1107_s12 = smov %s921_s13 }
 0x125   : > { %p10_p12 = scmp.ge.s32.totalorder %s13_s16, 5   ;;  %s1108_s13 = smov %s996_s22 }
 0x126   : > { %s1109_s14 = smov %s929_s15  ;;  %s1110_s15 = smov %s1112_s17 }
 0x127   :  { %12 = sbr.rel (!%p10_p12) target bundleno = 3 (0x3), region = 149 }

// kernel: gru_encoder_forward.9
= control target key start
LH: loop header
LB: loop body
LE: loop exit
PB: predicated region body
PF: predicated region fallthrough
CT: control target
= control target key end

     0   :  { %s1200_s12 = smov 0   ;;  %s1202_s13 = smov 0   ;;  %s1424_s0 = inlined_call_operand.vmem [shape: bf16[64,256], index: 0, kind: input, shape index: {}]   ;;  %s1425_s1 = inlined_call_operand.vmem [shape: bf16[256,768], index: 1, kind: input, shape index: {}]   ;;  %s1426_s2 = inlined_call_operand.vmem [shape: f32[1,768], index: 2, kind: input, shape index: {}]   ;;  %s1427_s3 = inlined_call_operand.vmem [shape: bf16[64,768], index: 3, kind: output, shape index: {}]  }
   0x1   :  { %s1204_s14 = smov 0   ;;  %s1206_s15 = smov 0  }
   0x2   :  { %s1208_s16 = smov 0  }
   0x3 LB: > { %s22_s17 = sadd.s32 1, %s1174_s15  ;;  %s933_s18 = sadd.s32 4294967295, %s1178_s16   ;;  %s1178_s16 = sphi %s1208_s16, %s13_s16   ;;  %s1174_s15 = sphi %s1206_s15, %s1432_s15   ;;  %s1170_s14 = sphi %s1204_s14, %s1431_s14   ;;  %s1166_s13 = sphi %s1202_s13, %s1430_s13   ;;  %s1162_s12 = sphi %s1200_s12, %s1429_s12  }
   0x4   : > { %p23_p0 = scmp.ge.s32.totalorder %s22_s17, 3  ;;  %p65_p1 = scmp.ne.s32.totalorder %s1166_s13, %s1162_s12 }
   0x5   : > { %p66_p2 = scmp.eq.s32.totalorder %s1178_s16, 0  ;;  %p123_p4 = scmp.eq.s32.totalorder %s933_s18, 2 }
   0x6   : > { %s1434_s17 = smov (%p23_p0, %s22_s17), 0  ;;  %s58_s20 = sadd.s32 1, %s1166_s13 }
   0x7   : > { %p67_p3 = por %p66_p2, %p65_p1  ;;  %s55_s19 = ssub.s32 %s1174_s15, %s1434_s17 }
   0x8   : > { %p56_p5 = scmp.eq.s32.totalorder %s55_s19, 0  ;;  %p1235_p6 = por %p123_p4, %p65_p1 }
   0x9   : > { %p937_p7 = scmp.ge.s32.totalorder %s1178_s16, 3 }
   0xa   : > { %s1240_s22 = scalar_select %p56_p5, %s1166_s13, %s58_s20  }
   0xb   : > { %155 = sbr.rel (%p937_p7) target bundleno = 36 (0x24), region = 20 }
  0x10   : > { %158 = sbr.rel (!%p67_p3) target bundleno = 36 (0x24), region = 24  ;;  %s160_s23 = sand.u32 (%p67_p3), 1, %s1166_s13  }
  0x11   : > { %s998_s24 = sshll.u32 (%p67_p3), %s1174_s15, 3  ;;  %s938_s25 = sshll.u32 (%p67_p3), %s160_s23, 8 }
  0x12   : > { %s1248_s28 = scalar_lea.vmem (%p67_p3), %s1425_s1, %s998_s24  ;;  %s1253_s29 = scalar_lea.vmem (%p67_p3), [#allocation2], %s938_s25 }
  0x13   : > { %v256_v0 = vld [vmem:[%s1248_s28] sm:$0xff] (%p67_p3)  ;;  %v258_v1 = vld [vmem:[%s1248_s28 + $0x18] sm:$0xff] (%p67_p3)  ;;  %v260_v2 = vld [vmem:[%s1248_s28 + $0x30] sm:$0xff] (%p67_p3) }
  0x14   : > { %257 = vst [vmem:[%s1253_s29] sm:$0xff] (%p67_p3), %v256_v0  ;;  %259 = vst [vmem:[%s1253_s29 + $0x8] sm:$0xff] (%p67_p3), %v258_v1  ;;  %v262_v3 = vld [vmem:[%s1248_s28 + $0x48] sm:$0xff] (%p67_p3)  ;;  %v264_v4 = vld [vmem:[%s1248_s28 + $0x60] sm:$0xff] (%p67_p3) }
  0x15   : > { %261 = vst [vmem:[%s1253_s29 + $0x10] sm:$0xff] %v260_v2  ;;  %v266_v5 = vld [vmem:[%s1248_s28 + $0x78] sm:$0xff]  ;;  %263 = vst [vmem:[%s1253_s29 + $0x18] sm:$0xff] %v262_v3  ;;  %v268_v6 = vld [vmem:[%s1248_s28 + $0x90] sm:$0xff] }
  0x16   : > { %265 = vst [vmem:[%s1253_s29 + $0x20] sm:$0xff] %v264_v4  ;;  %267 = vst [vmem:[%s1253_s29 + $0x28] sm:$0xff] %v266_v5  ;;  %v270_v7 = vld [vmem:[%s1248_s28 + $0xa8] sm:$0xff]  ;;  %v272_v8 = vld [vmem:[%s1248_s28 + $0xc0] sm:$0xff] }
  0x17   : > { %269 = vst [vmem:[%s1253_s29 + $0x30] sm:$0xff] %v268_v6  ;;  %271 = vst [vmem:[%s1253_s29 + $0x38] sm:$0xff] %v270_v7  ;;  %v274_v9 = vld [vmem:[%s1248_s28 + $0xd8] sm:$0xff]  ;;  %v276_v10 = vld [vmem:[%s1248_s28 + $0xf0] sm:$0xff] }
  0x18   : > { %273 = vst [vmem:[%s1253_s29 + $0x40] sm:$0xff] %v272_v8  ;;  %v278_v11 = vld [vmem:[%s1248_s28 + $0x108] sm:$0xff]  ;;  %275 = vst [vmem:[%s1253_s29 + $0x48] sm:$0xff] %v274_v9  ;;  %v280_v12 = vld [vmem:[%s1248_s28 + $0x120] sm:$0xff] }
  0x19   : > { %277 = vst [vmem:[%s1253_s29 + $0x50] sm:$0xff] %v276_v10  ;;  %279 = vst [vmem:[%s1253_s29 + $0x58] sm:$0xff] %v278_v11  ;;  %v282_v13 = vld [vmem:[%s1248_s28 + $0x138] sm:$0xff]  ;;  %v284_v14 = vld [vmem:[%s1248_s28 + $0x150] sm:$0xff] }
  0x1a   : > { %281 = vst [vmem:[%s1253_s29 + $0x60] sm:$0xff] %v280_v12  ;;  %283 = vst [vmem:[%s1253_s29 + $0x68] sm:$0xff] %v282_v13  ;;  %v286_v15 = vld [vmem:[%s1248_s28 + $0x168] sm:$0xff]  ;;  %v288_v16 = vld [vmem:[%s1248_s28 + $0x180] sm:$0xff] }
  0x1b   : > { %285 = vst [vmem:[%s1253_s29 + $0x70] sm:$0xff] %v284_v14  ;;  %v290_v17 = vld [vmem:[%s1248_s28 + $0x198] sm:$0xff]  ;;  %287 = vst [vmem:[%s1253_s29 + $0x78] sm:$0xff] %v286_v15  ;;  %v292_v18 = vld [vmem:[%s1248_s28 + $0x1b0] sm:$0xff] }
  0x1c   : > { %289 = vst [vmem:[%s1253_s29 + $0x80] sm:$0xff] %v288_v16  ;;  %291 = vst [vmem:[%s1253_s29 + $0x88] sm:$0xff] %v290_v17  ;;  %v294_v19 = vld [vmem:[%s1248_s28 + $0x1c8] sm:$0xff]  ;;  %v296_v20 = vld [vmem:[%s1248_s28 + $0x1e0] sm:$0xff] }
  0x1d   : > { %293 = vst [vmem:[%s1253_s29 + $0x90] sm:$0xff] %v292_v18  ;;  %295 = vst [vmem:[%s1253_s29 + $0x98] sm:$0xff] %v294_v19  ;;  %v298_v21 = vld [vmem:[%s1248_s28 + $0x1f8] sm:$0xff]  ;;  %v300_v22 = vld [vmem:[%s1248_s28 + $0x210] sm:$0xff] }
  0x1e   : > { %297 = vst [vmem:[%s1253_s29 + $0xa0] sm:$0xff] %v296_v20  ;;  %v302_v23 = vld [vmem:[%s1248_s28 + $0x228] sm:$0xff]  ;;  %299 = vst [vmem:[%s1253_s29 + $0xa8] sm:$0xff] %v298_v21  ;;  %v304_v24 = vld [vmem:[%s1248_s28 + $0x240] sm:$0xff] }
  0x1f   : > { %301 = vst [vmem:[%s1253_s29 + $0xb0] sm:$0xff] %v300_v22  ;;  %303 = vst [vmem:[%s1253_s29 + $0xb8] sm:$0xff] %v302_v23  ;;  %v306_v25 = vld [vmem:[%s1248_s28 + $0x258] sm:$0xff]  ;;  %v308_v26 = vld [vmem:[%s1248_s28 + $0x270] sm:$0xff] }
  0x20   : > { %305 = vst [vmem:[%s1253_s29 + $0xc0] sm:$0xff] %v304_v24  ;;  %307 = vst [vmem:[%s1253_s29 + $0xc8] sm:$0xff] %v306_v25  ;;  %v310_v27 = vld [vmem:[%s1248_s28 + $0x288] sm:$0xff]  ;;  %v312_v28 = vld [vmem:[%s1248_s28 + $0x2a0] sm:$0xff] }
  0x21   : > { %309 = vst [vmem:[%s1253_s29 + $0xd0] sm:$0xff] %v308_v26  ;;  %v314_v29 = vld [vmem:[%s1248_s28 + $0x2b8] sm:$0xff]  ;;  %311 = vst [vmem:[%s1253_s29 + $0xd8] sm:$0xff] %v310_v27  ;;  %v316_v30 = vld [vmem:[%s1248_s28 + $0x2d0] sm:$0xff] }
  0x22   : > { %313 = vst [vmem:[%s1253_s29 + $0xe0] sm:$0xff] %v312_v28  ;;  %315 = vst [vmem:[%s1253_s29 + $0xe8] sm:$0xff] %v314_v29  ;;  %v318_v31 = vld [vmem:[%s1248_s28 + $0x2e8] sm:$0xff] }
  0x23   : > { %317 = vst [vmem:[%s1253_s29 + $0xf0] sm:$0xff] %v316_v30  ;;  %319 = vst [vmem:[%s1253_s29 + $0xf8] sm:$0xff] %v318_v31 }
  0x24 PF: > { %p941_p8 = scmp.ge.s32.totalorder %s1178_s16, 1  ;;  %p332_p9 = scmp.lt.s32.totalorder %s1178_s16, 4 }
  0x26   : > { %p333_p10 = pnand %p941_p8, %p332_p9 }
  0x27   : > { %s339_s30 = sand.u32 (!%p333_p10), 1, %s1162_s12  }
  0x28   : > { %336 = sbr.rel (%p333_p10) target bundleno = 332 (0x14c), region = 66  ;;  %s942_s4 = sshll.u32 (!%p333_p10), %s339_s30, 8 }
  0x29   : > { %s1327_s9 = scalar_lea.vmem (!%p333_p10), [#allocation2], %s942_s4  ;;  %s944_s4 = sshll.u32 (!%p333_p10), %s1170_s14, 1 }
  0x2a   : > { %p380_p11 = scmp.lt.s32.totalorder (!%p333_p10), %s944_s4, 5  ;;  %s943_s8 = sshll.u32 (!%p333_p10), %s339_s30, 6 }
  0x2d   : > { %v1130_v32 = vld [vmem:[%s1424_s0 + $0x4] ss:$8 sps:$4 sm:$0xff]   ;;  %v1080_v34 = vld [vmem:[%s1327_s9 + $0x74] ss:$8 sps:$4 sm:$0xff]   ;;  %v1082_v35 = vld [vmem:[%s1327_s9 + $0x70] ss:$8 sps:$4 sm:$0xff]   ;;  %v428_v8 = vlaneseq }
  0x2e   : > { %v1133_v33 = vld [vmem:[%s1424_s0 + $0x24] ss:$8 sps:$4 sm:$0xff]   ;;  %670 = vmatprep.mubr.bf16.mxu0 %v1130_v32  ;;  %638 = vmatprep.subr.bf16.mxu0 %v1080_v34  ;;  %v1085_v37 = vld [vmem:[%s1327_s9 + $0x60] ss:$8 sps:$4 sm:$0xff]   ;;  %v1086_v38 = vld [vmem:[%s1327_s9 + $0x54] ss:$8 sps:$4 sm:$0xff]  }
  0x2f   : > { %690 = vmatprep.mubr.bf16.mxu1 %v1133_v33  ;;  %1008 = vmatprep.subr.bf16.mxu1 %v1080_v34  ;;  %v1083_v36 = vld [vmem:[%s1327_s9 + $0x64] ss:$8 sps:$4 sm:$0xff]   ;;  %v1088_v39 = vld [vmem:[%s1327_s9 + $0x50] ss:$8 sps:$4 sm:$0xff]   ;;  %v1091_v41 = vld [vmem:[%s1327_s9 + $0x40] ss:$8 sps:$4 sm:$0xff]  }
  0x30   : > { %639 = vmatpush1.bf16.msra.mxu0 %v1082_v35  ;;  %1024 = vmatpush1.bf16.msra.mxu1 %v1082_v35  ;;  %v1089_v40 = vld [vmem:[%s1327_s9 + $0x44] ss:$8 sps:$4 sm:$0xff]   ;;  %v1092_v42 = vld [vmem:[%s1327_s9 + $0x34] ss:$8 sps:$4 sm:$0xff]   ;;  %v1094_v43 = vld [vmem:[%s1327_s9 + $0x30] ss:$8 sps:$4 sm:$0xff]  }
  0x31   : > { %640 = vmatprep.subr.bf16.mxu0 %v1083_v36  ;;  %1009 = vmatprep.subr.bf16.mxu1 %v1083_v36  ;;  %v1095_v44 = vld [vmem:[%s1327_s9 + $0x24] ss:$8 sps:$4 sm:$0xff]   ;;  %v1097_v45 = vld [vmem:[%s1327_s9 + $0x20] ss:$8 sps:$4 sm:$0xff]   ;;  %v1098_v46 = vld [vmem:[%s1327_s9 + $0x14] ss:$8 sps:$4 sm:$0xff]  }
  0x32   : > { %v1100_v47 = vld [vmem:[%s1327_s9 + $0x10] ss:$8 sps:$4 sm:$0xff]   ;;  %v1101_v48 = vld [vmem:[%s1327_s9 + $0x4] ss:$8 sps:$4 sm:$0xff]   ;;  %v1103_v49 = vld [vmem:[%s1327_s9] ss:$8 sps:$4 sm:$0xff]  }
  0x33   : > { %v1104_v50 = vld [vmem:[%s1327_s9 + $0xf4] ss:$8 sps:$4 sm:$0xff]   ;;  %v1106_v51 = vld [vmem:[%s1327_s9 + $0xf0] ss:$8 sps:$4 sm:$0xff]   ;;  %v1107_v52 = vld [vmem:[%s1327_s9 + $0xe4] ss:$8 sps:$4 sm:$0xff]  }
  0x34   : > { %641 = vmatpush1.bf16.msra.mxu0 %v1085_v37  ;;  %1025 = vmatpush1.bf16.msra.mxu1 %v1085_v37  ;;  %v1109_v53 = vld [vmem:[%s1327_s9 + $0xe0] ss:$8 sps:$4 sm:$0xff]   ;;  %v1110_v54 = vld [vmem:[%s1327_s9 + $0xd4] ss:$8 sps:$4 sm:$0xff]   ;;  %v1112_v55 = vld [vmem:[%s1327_s9 + $0xd0] ss:$8 sps:$4 sm:$0xff]  }
  0x35   : > { %642 = vmatprep.subr.bf16.mxu0 %v1086_v38  ;;  %1010 = vmatprep.subr.bf16.mxu1 %v1086_v38  ;;  %v1113_v56 = vld [vmem:[%s1327_s9 + $0xc4] ss:$8 sps:$4 sm:$0xff]   ;;  %v1115_v57 = vld [vmem:[%s1327_s9 + $0xc0] ss:$8 sps:$4 sm:$0xff]   ;;  %v1116_v58 = vld [vmem:[%s1327_s9 + $0xb4] ss:$8 sps:$4 sm:$0xff]  }
  0x36   : > { %v1118_v59 = vld [vmem:[%s1327_s9 + $0xb0] ss:$8 sps:$4 sm:$0xff]   ;;  %v1119_v60 = vld [vmem:[%s1327_s9 + $0xa4] ss:$8 sps:$4 sm:$0xff]   ;;  %v1121_v61 = vld [vmem:[%s1327_s9 + $0xa0] ss:$8 sps:$4 sm:$0xff]  }
  0x37   : > { %v1122_v62 = vld [vmem:[%s1327_s9 + $0x94] ss:$8 sps:$4 sm:$0xff]   ;;  %v1124_v63 = vld [vmem:[%s1327_s9 + $0x90] ss:$8 sps:$4 sm:$0xff]   ;;  %v1125_v0 = vld [vmem:[%s1327_s9 + $0x84] ss:$8 sps:$4 sm:$0xff]  }
  0x38   : > { %643 = vmatpush1.bf16.msra.mxu0 %v1088_v39  ;;  %1026 = vmatpush1.bf16.msra.mxu1 %v1088_v39  ;;  %v1127_v1 = vld [vmem:[%s1327_s9 + $0x80] ss:$8 sps:$4 sm:$0xff]   ;;  %v1134_v4 = vld [vmem:[%s1424_s0 + $0x14] ss:$8 sps:$4 sm:$0xff]   ;;  %v1138_v6 = vld [vmem:[%s1424_s0 + $0x10] ss:$8 sps:$4 sm:$0xff]  }
  0x39   : > { %644 = vmatprep.subr.bf16.mxu0 %v1089_v40  ;;  %1011 = vmatprep.subr.bf16.mxu1 %v1089_v40  ;;  %v1128_v2 = vld [vmem:[%s1424_s0] ss:$8 sps:$4 sm:$0xff]   ;;  %v1136_v5 = vld [vmem:[%s1424_s0 + $0x34] ss:$8 sps:$4 sm:$0xff]   ;;  %v1139_v7 = vld [vmem:[%s1424_s0 + $0x30] ss:$8 sps:$4 sm:$0xff]  }
  0x3a   : > { %v1131_v3 = vld [vmem:[%s1424_s0 + $0x20] ss:$8 sps:$4 sm:$0xff]   ;;  %s1436_s4 = smov (!%p380_p11, %s944_s4), 5  ;;  %v429_v9 = vshrl.u32 %v428_v8, 7  ;;  %s1385_s9 = scalar_lea.vmem [#allocation3], %s943_s8 }
  0x3b   : > { %s382_s7 = scalar_lea.vmem %s1426_s2, %s1436_s4  ;;  %s1007_s12 = sshll.u32 (%p1235_p6), %s1170_s14, 3 }
  0x3c   : > { %645 = vmatpush1.bf16.msra.mxu0 %v1091_v41  ;;  %1027 = vmatpush1.bf16.msra.mxu1 %v1091_v41  ;;  %v430_v10 = vsub.s32 0, %v429_v9  ;;  %v434_v11 = vsub.s32 1, %v429_v9  ;;  %v426_v12 = vld [vmem:[%s382_s7] sm:$0x3]  ;;  %s779_s11 = scalar_lea.vmem (%p1235_p6), %s1427_s3, %s1007_s12 }
  0x3d   : > { %646 = vmatprep.subr.bf16.mxu0 %v1092_v42  ;;  %1012 = vmatprep.subr.bf16.mxu1 %v1092_v42 }
  0x3e   : > { %v431_v13 = vrot.slane %v426_v12, %v430_v10  ;;  %v435_v14 = vrot.slane %v426_v12, %v434_v11 }
  0x40   : > { %647 = vmatpush1.bf16.msra.mxu0 %v1094_v43  ;;  %1028 = vmatpush1.bf16.msra.mxu1 %v1094_v43 }
  0x41   : > { %648 = vmatprep.subr.bf16.mxu0 %v1095_v44  ;;  %1013 = vmatprep.subr.bf16.mxu1 %v1095_v44 }
  0x44   : > { %649 = vmatpush1.bf16.msra.mxu0 %v1097_v45  ;;  %1029 = vmatpush1.bf16.msra.mxu1 %v1097_v45 }
  0x45   : > { %650 = vmatprep.subr.bf16.mxu0 %v1098_v46  ;;  %1014 = vmatprep.subr.bf16.mxu1 %v1098_v46 }
  0x48   : > { %651 = vmatpush1.bf16.msra.mxu0 %v1100_v47  ;;  %1030 = vmatpush1.bf16.msra.mxu1 %v1100_v47 }
  0x49   : > { %652 = vmatprep.subr.bf16.mxu0 %v1101_v48  ;;  %1015 = vmatprep.subr.bf16.mxu1 %v1101_v48 }
  0x4c   : > { %653 = vmatpush1.bf16.msra.mxu0 %v1103_v49  ;;  %1031 = vmatpush1.bf16.msra.mxu1 %v1103_v49 }
  0x4d   : > { %654 = vmatprep.subr.bf16.mxu0 %v1104_v50  ;;  %1016 = vmatprep.subr.bf16.mxu1 %v1104_v50 }
  0x50   : > { %655 = vmatpush2.bf16.msra.mxu0 %v1106_v51  ;;  %1032 = vmatpush2.bf16.msra.mxu1 %v1106_v51 }
  0x51   : > { %656 = vmatprep.subr.bf16.mxu0 %v1107_v52  ;;  %1017 = vmatprep.subr.bf16.mxu1 %v1107_v52 }
  0x54   : > { %657 = vmatpush2.bf16.msra.mxu0 %v1109_v53  ;;  %1033 = vmatpush2.bf16.msra.mxu1 %v1109_v53 }
  0x55   : > { %658 = vmatprep.subr.bf16.mxu0 %v1110_v54  ;;  %1018 = vmatprep.subr.bf16.mxu1 %v1110_v54 }
  0x58   : > { %659 = vmatpush2.bf16.msra.mxu0 %v1112_v55  ;;  %1034 = vmatpush2.bf16.msra.mxu1 %v1112_v55 }
  0x59   : > { %660 = vmatprep.subr.bf16.mxu0 %v1113_v56  ;;  %1019 = vmatprep.subr.bf16.mxu1 %v1113_v56 }
  0x5c   : > { %661 = vmatpush2.bf16.msra.mxu0 %v1115_v57  ;;  %1035 = vmatpush2.bf16.msra.mxu1 %v1115_v57 }
  0x5d   : > { %662 = vmatprep.subr.bf16.mxu0 %v1116_v58  ;;  %1020 = vmatprep.subr.bf16.mxu1 %v1116_v58 }
  0x60   : > { %663 = vmatpush2.bf16.msra.mxu0 %v1118_v59  ;;  %1036 = vmatpush2.bf16.msra.mxu1 %v1118_v59 }
  0x61   : > { %664 = vmatprep.subr.bf16.mxu0 %v1119_v60  ;;  %1021 = vmatprep.subr.bf16.mxu1 %v1119_v60 }
  0x64   : > { %665 = vmatpush2.bf16.msra.mxu0 %v1121_v61  ;;  %1037 = vmatpush2.bf16.msra.mxu1 %v1121_v61 }
  0x65   : > { %666 = vmatprep.subr.bf16.mxu0 %v1122_v62  ;;  %1022 = vmatprep.subr.bf16.mxu1 %v1122_v62 }
  0x68   : > { %667 = vmatpush2.bf16.msra.mxu0 %v1124_v63  ;;  %1038 = vmatpush2.bf16.msra.mxu1 %v1124_v63 }
  0x69   : > { %668 = vmatprep.subr.bf16.mxu0 %v1125_v0  ;;  %1023 = vmatprep.subr.bf16.mxu1 %v1125_v0 }
  0x6c   : > { %669 = vmatpush2.bf16.msra.mxu0 %v1127_v1  ;;  %1039 = vmatpush2.bf16.msra.mxu1 %v1127_v1 }
  0x6f   : > { %671 = vmatmul.mubr.bf16.vlgmr.msra.gmra.mxu0 %v1128_v2  ;;  %691 = vmatmul.mubr.bf16.vlgmr.msra.gmra.mxu1 %v1131_v3 }
  0x70   : > { %680 = vmatprep.mubr.bf16.mxu0 %v1134_v4  ;;  %700 = vmatprep.mubr.bf16.mxu1 %v1136_v5 }
  0x77   : > { %681 = vmatmul.mubr.bf16.gmra.mxu0 %v1138_v6  ;;  %701 = vmatmul.mubr.bf16.gmra.mxu1 %v1139_v7 }
 0x12f   : > { %v672_v15 = vpop.f32.mrf.mxu0  ;;  %v692_v16 = vpop.f32.mrf.mxu1 }
 0x130   : > { %v673_v19 = vadd.f32 %v672_v15, %v431_v13  ;;  %v693_v20 = vadd.f32 %v692_v16, %v431_v13 }
 0x131   : > { %v674_v17 = vpop.f32.mrf.mxu0  ;;  %v694_v18 = vpop.f32.mrf.mxu1 }
 0x132   : > { %v675_v21 = vadd.f32 %v674_v17, %v435_v14  ;;  %v695_v22 = vadd.f32 %v694_v18, %v435_v14 }
 0x133   : > { %v676_v23 = vpop.f32.mrf.mxu0  ;;  %v696_v24 = vpop.f32.mrf.mxu1 }
 0x134   : > { %v999_v25 = vpack.c.bf16 %v675_v21, %v673_v19  ;;  %v1003_v26 = vpack.c.bf16 %v695_v22, %v693_v20  ;;  %v677_v29 = vadd.f32 %v676_v23, %v431_v13  ;;  %v697_v30 = vadd.f32 %v696_v24, %v431_v13 }
 0x135   : > { %v678_v27 = vpop.f32.mrf.mxu0  ;;  %v698_v28 = vpop.f32.mrf.mxu1 }
 0x136   : > { %759 = vst [vmem:[%s1385_s9] sm:$0xff] %v999_v25  ;;  %763 = vst [vmem:[%s1385_s9 + $0x20] sm:$0xff] %v1003_v26  ;;  %v679_v31 = vadd.f32 %v678_v27, %v435_v14  ;;  %v699_v32 = vadd.f32 %v698_v28, %v435_v14 }
 0x137   : > { %v682_v33 = vpop.f32.mrf.mxu0  ;;  %v702_v34 = vpop.f32.mrf.mxu1 }
 0x138   : > { %v1000_v35 = vpack.c.bf16 %v679_v31, %v677_v29  ;;  %v1004_v36 = vpack.c.bf16 %v699_v32, %v697_v30  ;;  %v683_v39 = vadd.f32 %v682_v33, %v431_v13  ;;  %v703_v40 = vadd.f32 %v702_v34, %v431_v13 }
 0x139   : > { %v684_v37 = vpop.f32.mrf.mxu0  ;;  %v704_v38 = vpop.f32.mrf.mxu1 }
 0x13a   : > { %760 = vst [vmem:[%s1385_s9 + $0x8] sm:$0xff] %v1000_v35  ;;  %764 = vst [vmem:[%s1385_s9 + $0x28] sm:$0xff] %v1004_v36  ;;  %v685_v41 = vadd.f32 %v684_v37, %v435_v14  ;;  %v705_v42 = vadd.f32 %v704_v38, %v435_v14 }
 0x13b   : > { %v686_v43 = vpop.f32.mrf.mxu0  ;;  %v706_v44 = vpop.f32.mrf.mxu1 }
 0x13c   : > { %v1001_v45 = vpack.c.bf16 %v685_v41, %v683_v39  ;;  %v1005_v46 = vpack.c.bf16 %v705_v42, %v703_v40  ;;  %v687_v49 = vadd.f32 %v686_v43, %v431_v13  ;;  %v707_v50 = vadd.f32 %v706_v44, %v431_v13 }
 0x13d   : > { %v688_v47 = vpop.f32.mrf.mxu0  ;;  %v708_v48 = vpop.f32.mrf.mxu1  ;;  %v822_v55 = vld [vmem:[%s1385_s9] sm:$0xff] (%p1235_p6) }
 0x13e   : > { %761 = vst [vmem:[%s1385_s9 + $0x10] sm:$0xff] %v1001_v45  ;;  %765 = vst [vmem:[%s1385_s9 + $0x30] sm:$0xff] %v1005_v46  ;;  %v689_v51 = vadd.f32 %v688_v47, %v435_v14  ;;  %v709_v52 = vadd.f32 %v708_v48, %v435_v14  ;;  %773 = sbr.rel (!%p1235_p6) target bundleno = 332 (0x14c), region = 74  ;;  %v830_v59 = vld [vmem:[%s1385_s9 + $0x20] sm:$0xff] (%p1235_p6) }
 0x13f   : > { %823 = vst [vmem:[%s779_s11] sm:$0xff] (%p1235_p6), %v822_v55  ;;  %831 = vst [vmem:[%s779_s11 + $0x60] sm:$0xff] (%p1235_p6), %v830_v59 }
 0x140   : > { %v1002_v53 = vpack.c.bf16 %v689_v51, %v687_v49  ;;  %v1006_v54 = vpack.c.bf16 %v709_v52, %v707_v50 }
 0x141   : > { %v824_v56 = vld [vmem:[%s1385_s9 + $0x8] sm:$0xff] (%p1235_p6) }
 0x142   : > { %762 = vst [vmem:[%s1385_s9 + $0x18] sm:$0xff] %v1002_v53  ;;  %766 = vst [vmem:[%s1385_s9 + $0x38] sm:$0xff] %v1006_v54  ;;  %v832_v60 = vld [vmem:[%s1385_s9 + $0x28] sm:$0xff] (%p1235_p6) }
 0x143   : > { %825 = vst [vmem:[%s779_s11 + $0x18] sm:$0xff] %v824_v56  ;;  %833 = vst [vmem:[%s779_s11 + $0x78] sm:$0xff] %v832_v60 }
 0x145   : > { %v826_v57 = vld [vmem:[%s1385_s9 + $0x10] sm:$0xff] }
 0x146   : > { %827 = vst [vmem:[%s779_s11 + $0x30] sm:$0xff] %v826_v57  ;;  %v834_v61 = vld [vmem:[%s1385_s9 + $0x30] sm:$0xff] }
 0x147   : > { %835 = vst [vmem:[%s779_s11 + $0x90] sm:$0xff] %v834_v61 }
 0x149   : > { %v828_v58 = vld [vmem:[%s1385_s9 + $0x18] sm:$0xff] }
 0x14a   : > { %829 = vst [vmem:[%s779_s11 + $0x48] sm:$0xff] %v828_v58  ;;  %v836_v62 = vld [vmem:[%s1385_s9 + $0x38] sm:$0xff] }
 0x14b   : > { %837 = vst [vmem:[%s779_s11 + $0xa8] sm:$0xff] %v836_v62 }
 0x14c PF: > { %s13_s16 = sadd.s32 1, %s1178_s16   ;;  %s1429_s12 = smov %s1166_s13 }
 0x14d   : > { %p10_p12 = scmp.ge.s32.totalorder %s13_s16, 5   ;;  %s1430_s13 = smov %s1240_s22 }
 0x14e   : > { %s1431_s14 = smov %s1174_s15  ;;  %s1432_s15 = smov %s1434_s17 }
 0x14f   :  { %12 = sbr.rel (!%p10_p12) target bundleno = 3 (0x3), region = 149 }

// kernel: gru_encoder_forward.8
= control target key start
LH: loop header
LB: loop body
LE: loop exit
PB: predicated region body
PF: predicated region fallthrough
CT: control target
= control target key end

     0   :  { %s1583_s12 = smov 0   ;;  %s1585_s13 = smov 0   ;;  %s2134_s0 = inlined_call_operand.vmem [shape: bf16[8,8,768], index: 0, kind: input, shape index: {}]   ;;  %s2135_s1 = inlined_call_operand.vmem [shape: bf16[2,128,384], index: 1, kind: input, shape index: {}]   ;;  %s2136_s2 = inlined_call_operand.vmem [shape: f32[2,1,384], index: 2, kind: input, shape index: {}]   ;;  %s2137_s3 = inlined_call_operand.vmem [shape: bf16[8,8,256], index: 3, kind: output, shape index: {}]  }
   0x1   :  { %s1587_s14 = smov 0   ;;  %s1589_s15 = smov 0  }
   0x2   :  { %s1591_s16 = smov 0  }
   0x3 LB: > { %s25_s17 = sadd.s32 1, %s1546_s15  ;;  %s1210_s18 = sadd.s32 4294967295, %s1550_s16   ;;  %s1550_s16 = sphi %s1591_s16, %s13_s16   ;;  %s1546_s15 = sphi %s1589_s15, %s2191_s15   ;;  %s1542_s14 = sphi %s1587_s14, %s2190_s14   ;;  %s1538_s13 = sphi %s1585_s13, %s2189_s13   ;;  %s1534_s12 = sphi %s1583_s12, %s2188_s12  }
   0x4   : > { %p27_p0 = scmp.ge.s32.totalorder %s25_s17, 2  ;;  %p49_p1 = scmp.ne.s32.totalorder %s1538_s13, %s1534_s12 }
   0x5   : > { %p50_p2 = scmp.eq.s32.totalorder %s1550_s16, 0  ;;  %p141_p4 = scmp.eq.s32.totalorder %s1210_s18, 1 }
   0x6   : > { %s2193_s17 = smov (%p27_p0, %s25_s17), 0  ;;  %s42_s20 = sadd.s32 1, %s1538_s13 }
   0x7   : > { %p51_p3 = por %p50_p2, %p49_p1  ;;  %s38_s19 = ssub.s32 %s1546_s15, %s2193_s17 }
   0x8   : > { %p40_p5 = scmp.eq.s32.totalorder %s38_s19, 0  ;;  %p1618_p6 = por %p141_p4, %p49_p1 }
   0x9   : > { %p1213_p7 = scmp.ge.s32.totalorder %s1550_s16, 2 }
   0xa   : > { %s1623_s22 = scalar_select %p40_p5, %s1538_s13, %s42_s20  }
   0xb   : > { %163 = sbr.rel (%p1213_p7) target bundleno = 30 (0x1e), region = 16 }
  0x10   : > { %166 = sbr.rel (!%p51_p3) target bundleno = 30 (0x1e), region = 20  ;;  %s168_s23 = sand.u32 (%p51_p3), 1, %s1538_s13  }
  0x11   : > { %s1279_s24 = smul.u32 (%p51_p3), 12, %s1546_s15 }
  0x12   : > { %s1400_s25 = smul.u32 (%p51_p3), 96, %s168_s23 }
  0x13   : > { %s1631_s28 = scalar_lea.vmem (%p51_p3), %s2134_s0, %s1279_s24 }
  0x14   : > { %v195_v0 = vld [vmem:[%s1631_s28] sm:$0xff] (%p51_p3)  ;;  %v197_v1 = vld [vmem:[%s1631_s28 + $0x18] sm:$0xff] (%p51_p3)  ;;  %v199_v2 = vld [vmem:[%s1631_s28 + $0x30] sm:$0xff] (%p51_p3)  ;;  %s170_s29 = scalar_lea.vmem (%p51_p3), [#allocation3], %s1400_s25 }
  0x15   : > { %196 = vst [vmem:[%s170_s29] sm:$0xff] %v195_v0  ;;  %198 = vst [vmem:[%s170_s29 + $0xc] sm:$0xff] %v197_v1  ;;  %v201_v3 = vld [vmem:[%s1631_s28 + $0x48] sm:$0xff]  ;;  %v203_v4 = vld [vmem:[%s1631_s28 + $0x60] sm:$0xff] }
  0x16   : > { %200 = vst [vmem:[%s170_s29 + $0x18] sm:$0xff] %v199_v2  ;;  %v205_v5 = vld [vmem:[%s1631_s28 + $0x78] sm:$0xff]  ;;  %202 = vst [vmem:[%s170_s29 + $0x24] sm:$0xff] %v201_v3  ;;  %v207_v6 = vld [vmem:[%s1631_s28 + $0x90] sm:$0xff] }
  0x17   : > { %204 = vst [vmem:[%s170_s29 + $0x30] sm:$0xff] %v203_v4  ;;  %206 = vst [vmem:[%s170_s29 + $0x3c] sm:$0xff] %v205_v5  ;;  %v209_v7 = vld [vmem:[%s1631_s28 + $0xa8] sm:$0xff]  ;;  %v1217_v9 = vld [vmem:[%s1631_s28 + $0x20] sm:$0xf] }
  0x18   : > { %v1215_v8 = vld [vmem:[%s1631_s28 + $0x8] sm:$0xf]  ;;  %208 = vst [vmem:[%s170_s29 + $0x48] sm:$0xff] %v207_v6  ;;  %210 = vst [vmem:[%s170_s29 + $0x54] sm:$0xff] %v209_v7  ;;  %v1219_v10 = vld [vmem:[%s1631_s28 + $0x38] sm:$0xf] }
  0x19   : > { %1216 = vst [vmem:[%s170_s29 + $0x8] sm:$0xf] %v1215_v8  ;;  %v1221_v11 = vld [vmem:[%s1631_s28 + $0x50] sm:$0xf]  ;;  %1218 = vst [vmem:[%s170_s29 + $0x14] sm:$0xf] %v1217_v9 }
  0x1a   : > { %1220 = vst [vmem:[%s170_s29 + $0x20] sm:$0xf] %v1219_v10  ;;  %1222 = vst [vmem:[%s170_s29 + $0x2c] sm:$0xf] %v1221_v11  ;;  %v1223_v12 = vld [vmem:[%s1631_s28 + $0x68] sm:$0xf] }
  0x1b   : > { %v1225_v13 = vld [vmem:[%s1631_s28 + $0x80] sm:$0xf]  ;;  %v1227_v14 = vld [vmem:[%s1631_s28 + $0x98] sm:$0xf]  ;;  %1224 = vst [vmem:[%s170_s29 + $0x38] sm:$0xf] %v1223_v12 }
  0x1c   : > { %1226 = vst [vmem:[%s170_s29 + $0x44] sm:$0xf] %v1225_v13  ;;  %1228 = vst [vmem:[%s170_s29 + $0x50] sm:$0xf] %v1227_v14  ;;  %v1229_v15 = vld [vmem:[%s1631_s28 + $0xb0] sm:$0xf] }
  0x1d   : > { %1230 = vst [vmem:[%s170_s29 + $0x5c] sm:$0xf] %v1229_v15 }
  0x1e PF: > { %p1231_p8 = scmp.ge.s32.totalorder %s1550_s16, 1  ;;  %p254_p9 = scmp.lt.s32.totalorder %s1550_s16, 3 }
  0x20   : > { %p255_p10 = pnand %p1231_p8, %p254_p9 }
  0x22   : > { %258 = sbr.rel (%p255_p10) target bundleno = 1125 (0x465), region = 54 }
  0x27   : > { %s261_s30 = sand.u32 1, %s1534_s12   ;;  %p298_p11 = scmp.lt.s32.totalorder %s1542_s14, 1  ;;  %v353_v16 = vlaneseq  ;;  %v1779_v57 = vmov 0.0  }
  0x28   : > { %s1653_s4 = smul.u32 96, %s261_s30  ;;  %s1655_s5 = sshll.u32 %s261_s30, 5 }
  0x29   : > { %p313_p12 = scmp.eq.s32.totalorder %s1542_s14, 1  ;;  %v354_v26 = vshrl.u32 %v353_v16, 7  ;;  %s1777_s23 = scalar_lea.vmem [#allocation4], %s1655_s5 }
  0x2a   : > { %s1659_s6 = scalar_select %p298_p11, %s1542_s14, 1 }
  0x2b   : > { %v355_v39 = vsub.s32 0, %v354_v26  ;;  %v359_v40 = vsub.s32 1, %v354_v26  ;;  %v363_v44 = vsub.s32 2, %v354_v26  ;;  %s1774_s20 = scalar_lea.vmem [#allocation3], %s1653_s4  ;;  %s1781_s24 = smov 0  }
  0x2c   : > { %s1402_s7 = smul.u32 192, %s1659_s6 }
  0x2d   : > { %s1403_s11 = smul.u32 3, %s1659_s6 }
  0x2e   : > { %s1665_s10 = scalar_lea.vmem %s2135_s1, %s1402_s7 }
  0x2f   : > { %v1668_v17 = vld [vmem:[%s1665_s10] sm:$0xff]  ;;  %v1671_v18 = vld [vmem:[%s1665_s10 + $0x8] sm:$0xf]  ;;  %v1674_v19 = vld [vmem:[%s1665_s10 + $0xc] sm:$0xff]  ;;  %s306_s19 = scalar_lea.vmem %s2136_s2, %s1403_s11 }
  0x30   : > { %2152 = vst [vmem:[#allocation5_spill] sm:$0xff] %v1668_v17  ;;  %2153 = vst [vmem:[#allocation6_spill] sm:$0xff] %v1671_v18  ;;  %v1677_v20 = vld [vmem:[%s1665_s10 + $0x14] sm:$0xf]  ;;  %v1680_v21 = vld [vmem:[%s1665_s10 + $0x18] sm:$0xff] }
  0x31   : > { %2154 = vst [vmem:[#allocation7_spill] sm:$0xff] %v1674_v19  ;;  %2155 = vst [vmem:[#allocation8_spill] sm:$0xff] %v1677_v20  ;;  %v1683_v22 = vld [vmem:[%s1665_s10 + $0x20] sm:$0xf]  ;;  %v1686_v23 = vld [vmem:[%s1665_s10 + $0x24] sm:$0xff] }
  0x32   : > { %2156 = vst [vmem:[#allocation9_spill] sm:$0xff] %v1680_v21  ;;  %2157 = vst [vmem:[#allocation10_spill] sm:$0xff] %v1683_v22  ;;  %v1689_v24 = vld [vmem:[%s1665_s10 + $0x2c] sm:$0xf]  ;;  %v1692_v25 = vld [vmem:[%s1665_s10 + $0x30] sm:$0xff] }
  0x33   : > { %2158 = vst [vmem:[#allocation11_spill] sm:$0xff] %v1686_v23  ;;  %2159 = vst [vmem:[#allocation12_spill] sm:$0xff] %v1689_v24  ;;  %v1696_v27 = vld [vmem:[%s1665_s10 + $0x38] sm:$0xf]  ;;  %v1699_v28 = vld [vmem:[%s1665_s10 + $0x3c] sm:$0xff] }
  0x34   : > { %2160 = vst [vmem:[#allocation13_spill] sm:$0xff] %v1692_v25  ;;  %2161 = vst [vmem:[#allocation14_spill] sm:$0xff] %v1696_v27  ;;  %v1702_v29 = vld [vmem:[%s1665_s10 + $0x44] sm:$0xf]  ;;  %v1705_v30 = vld [vmem:[%s1665_s10 + $0x48] sm:$0xff] }
  0x35   : > { %2162 = vst [vmem:[#allocation15_spill] sm:$0xff] %v1699_v28  ;;  %2163 = vst [vmem:[#allocation16_spill] sm:$0xff] %v1702_v29  ;;  %v1708_v31 = vld [vmem:[%s1665_s10 + $0x50] sm:$0xf]  ;;  %v1711_v32 = vld [vmem:[%s1665_s10 + $0x54] sm:$0xff] }
  0x36   : > { %2164 = vst [vmem:[#allocation17_spill] sm:$0xff] %v1705_v30  ;;  %2165 = vst [vmem:[#allocation18_spill] sm:$0xff] %v1708_v31  ;;  %v1714_v33 = vld [vmem:[%s1665_s10 + $0x5c] sm:$0xf]  ;;  %v1717_v34 = vld [vmem:[%s1665_s10 + $0x60] sm:$0xff] }
  0x37   : > { %2166 = vst [vmem:[#allocation19_spill] sm:$0xff] %v1711_v32  ;;  %2167 = vst [vmem:[#allocation20_spill] sm:$0xff] %v1714_v33  ;;  %v1720_v35 = vld [vmem:[%s1665_s10 + $0x68] sm:$0xf]  ;;  %v1723_v36 = vld [vmem:[%s1665_s10 + $0x6c] sm:$0xff] }
  0x38   : > { %2168 = vst [vmem:[#allocation21_spill] sm:$0xff] %v1717_v34  ;;  %v1726_v37 = vld [vmem:[%s1665_s10 + $0x74] sm:$0xf]  ;;  %v1729_v38 = vld [vmem:[%s1665_s10 + $0x78] sm:$0xff]  ;;  %v1735_v41 = vld [vmem:[%s1665_s10 + $0x80] sm:$0xf] }
  0x39   : > { %v1738_v42 = vld [vmem:[%s1665_s10 + $0x84] sm:$0xff]  ;;  %v1741_v43 = vld [vmem:[%s1665_s10 + $0x8c] sm:$0xf]  ;;  %v1744_v45 = vld [vmem:[%s1665_s10 + $0x90] sm:$0xff] }
  0x3a   : > { %v1747_v46 = vld [vmem:[%s1665_s10 + $0x98] sm:$0xf]  ;;  %v1750_v47 = vld [vmem:[%s1665_s10 + $0x9c] sm:$0xff]  ;;  %v1753_v48 = vld [vmem:[%s1665_s10 + $0xa4] sm:$0xf] }
  0x3b   : > { %v1756_v49 = vld [vmem:[%s1665_s10 + $0xa8] sm:$0xff]  ;;  %v1759_v50 = vld [vmem:[%s1665_s10 + $0xb0] sm:$0xf]  ;;  %v1762_v51 = vld [vmem:[%s1665_s10 + $0xb4] sm:$0xff] }
  0x3c   : > { %v1765_v52 = vld [vmem:[%s1665_s10 + $0xbc] sm:$0xf]  ;;  %v351_v53 = vld [vmem:[%s306_s19] sm:$0x7] }
  0x3d   : > { %v1767_v54 = vrot.slane %v351_v53, %v355_v39  ;;  %v1769_v55 = vrot.slane %v351_v53, %v359_v40  ;;  %v1771_v56 = vrot.slane %v351_v53, %v363_v44 }
  0x3e LB: >> { %v2170_v32 = vld [vmem:[#allocation19_spill] sm:$0xff]  ;;  %v2171_v30 = vld [vmem:[#allocation17_spill] sm:$0xff]  ;;  %v1791_v58 = vcombine.high %v1756_v49, %v1762_v51  ;;  %v1795_v59 = vcombine.low %v1756_v49, %v1762_v51  ;;  %v1799_v60 = vcombine.high %v1744_v45, %v1750_v47  ;;  %v1805_v61 = vcombine.low %v1744_v45, %v1750_v47  ;;  %v2178_v33 = vld [vmem:[#allocation20_spill] sm:$0xff]  ;;  %s1960_s25 = sshll.u32 %s1558_s24, 2  ;;  %s377_s24 = sadd.s32 1, %s1558_s24   ;;  %v1554_v57 = vphi %v1779_v57, %v995_v57   ;;  %s1558_s24 = sphi %s1781_s24, %s377_s24  }
  0x3f   : >> { %v2169_v34 = vld [vmem:[#allocation21_spill] sm:$0xff]  ;;  %v2172_v28 = vld [vmem:[#allocation15_spill] sm:$0xff]  ;;  %v1810_v62 = vcombine.high %v1729_v38, %v1738_v42  ;;  %v2142_v63 = vmov 0.0   ;;  %v1815_v0 = vcombine.low %v1759_v50, %v1765_v52  ;;  %v2138_v1 = vmov 0   ;;  %v2179_v31 = vld [vmem:[#allocation18_spill] sm:$0xff]  ;;  %s380_s26 = ssub.s32 7, %s1960_s25 }
  0x40   : >> { %v2173_v25 = vld [vmem:[#allocation13_spill] sm:$0xff]  ;;  %v2174_v23 = vld [vmem:[#allocation11_spill] sm:$0xff]  ;;  %519 = vmatprep.subr.bf16.mxu0 %v1791_v58  ;;  %1320 = vmatprep.subr.bf16.mxu1 %v2142_v63  ;;  %v1821_v2 = vcombine.low %v1747_v46, %v1753_v48  ;;  %v1826_v3 = vcombine.low %v1729_v38, %v1738_v42  ;;  %v1832_v4 = vcombine.high %v2169_v34, %v1723_v36  ;;  %vm1562_vm0 = vmmov 0   ;;  %v2180_v29 = vld [vmem:[#allocation16_spill] sm:$0xff]  ;;  %s2195_s26 = smov (!%p313_p12, %s380_s26), %s1960_s25  ;;  %s631_s5 = sadd.s32 1, %s1960_s25 }
  0x41   : >> { %v2175_v21 = vld [vmem:[#allocation9_spill] sm:$0xff]  ;;  %v2176_v19 = vld [vmem:[#allocation7_spill] sm:$0xff]  ;;  %520 = vmatpush1.bf16.msra.mxu0 %v1795_v59  ;;  %551 = vmatprep.mubr.bf16.mxu0 %v2138_v1  ;;  %v1839_v5 = vcombine.low %v1735_v41, %v1741_v43  ;;  %v1844_v6 = vcombine.low %v2169_v34, %v1723_v36  ;;  %v1850_v7 = vcombine.high %v2171_v30, %v2170_v32  ;;  %v2181_v27 = vld [vmem:[#allocation14_spill] sm:$0xff]  ;;  %s1280_s27 = smul.u32 12, %s2195_s26  ;;  %p622_p13 = scmp.lt.s32.totalorder %s2195_s26, 7 }
  0x42   : >> { %v2177_v17 = vld [vmem:[#allocation5_spill] sm:$0xff]  ;;  %521 = vmatprep.subr.bf16.mxu0 %v1799_v60  ;;  %1321 = vmatpush3.bf16.msra.mxu1 %v1815_v0  ;;  %v1855_v8 = vcombine.low %v1720_v35, %v1726_v37  ;;  %v1860_v9 = vcombine.low %v2171_v30, %v2170_v32  ;;  %v1866_v10 = vcombine.high %v2173_v25, %v2172_v28  ;;  %v2182_v24 = vld [vmem:[#allocation12_spill] sm:$0xff]  ;;  %v2183_v22 = vld [vmem:[#allocation10_spill] sm:$0xff]  ;;  %s1262_s30 = sshll.u32 %s2195_s26, 2  ;;  %s632_s6 = ssub.s32 6, %s1960_s25 }
  0x43   : >> { %1322 = vmatprep.subr.bf16.mxu1 %v2142_v63  ;;  %1336 = vmatprep.mubr.msk.bf16.mxu1 %vm1562_vm0, %v2142_v63  ;;  %v1871_v11 = vcombine.low %v2179_v31, %v2178_v33  ;;  %v1876_v12 = vcombine.low %v2173_v25, %v2172_v28  ;;  %v1882_v13 = vcombine.high %v2175_v21, %v2174_v23  ;;  %v2184_v20 = vld [vmem:[#allocation8_spill] sm:$0xff]  ;;  %v2185_v18 = vld [vmem:[#allocation6_spill] sm:$0xff]  ;;  %s384_s28 = scalar_lea.vmem %s1774_s20, %s1280_s27 [#allocation3]  ;;  %s629_s4 = scalar_lea.vmem %s1777_s23, %s1262_s30 [#allocation4] }
  0x44   : >> { %v1887_v14 = vcombine.low %v2181_v27, %v2180_v29  ;;  %v1892_v15 = vcombine.low %v2175_v21, %v2174_v23  ;;  %v1898_v16 = vcombine.high %v2177_v17, %v2176_v19  ;;  %v1903_v26 = vcombine.low %v2183_v22, %v2182_v24  ;;  %v385_v53 = vld [vmem:[%s384_s28] sm:$0xff]  ;;  %s623_s29 = scalar_select %p622_p13, 1, 0 }
  0x45   : >> { %522 = vmatpush1.bf16.msra.mxu0 %v1805_v61  ;;  %v1908_v39 = vcombine.low %v2177_v17, %v2176_v19  ;;  %v390_v40 = vpack.c.bf16 %v1554_v57, %v1554_v57  ;;  %v1917_v44 = vcombine.low %v2185_v18, %v2184_v20  ;;  %v388_v22 = vunpack.c.h.bf16 %v385_v53  ;;  %s2197_s6 = smov (!%p313_p12, %s632_s6), %s631_s5  ;;  %s754_s12 = sadd.s32 2, %s1960_s25 }
  0x46   : >> { %523 = vmatprep.subr.bf16.mxu0 %v1810_v62  ;;  %1323 = vmatpush3.bf16.msra.mxu1 %v1821_v2  ;;  %s1281_s7 = smul.u32 12, %s2197_s6  ;;  %p745_p0 = scmp.lt.s32.totalorder %s2197_s6, 7 }
  0x47   : >> { %1324 = vmatprep.subr.bf16.mxu1 %v2142_v63  ;;  %s1266_s10 = sshll.u32 %s2197_s6, 2  ;;  %s755_s18 = ssub.s32 5, %s1960_s25 }
  0x48   : >> { %s636_s8 = scalar_lea.vmem %s1774_s20, %s1281_s7 [#allocation3]  ;;  %s752_s11 = scalar_lea.vmem %s1777_s23, %s1266_s10 [#allocation4] }
  0x49   : >> { %524 = vmatpush1.bf16.msra.mxu0 %v1826_v3  ;;  %v638_v34 = vld [vmem:[%s636_s8 + $0x8] sm:$0xf]  ;;  %s746_s9 = scalar_select %p745_p0, 1, 0 }
  0x4a   : >> { %525 = vmatprep.subr.bf16.mxu0 %v1832_v4  ;;  %1325 = vmatpush3.bf16.msra.mxu1 %v1839_v5  ;;  %s2199_s18 = smov (!%p313_p12, %s755_s18), %s754_s12  ;;  %s877_s30 = sadd.s32 3, %s1960_s25 }
  0x4b   : >> { %1326 = vmatprep.subr.bf16.mxu1 %v2142_v63  ;;  %s1282_s19 = smul.u32 12, %s2199_s18  ;;  %p868_p1 = scmp.lt.s32.totalorder %s2199_s18, 7 }
  0x4c   : >> { %p374_p3 = scmp.ge.s32.totalorder %s377_s24, 2  }
  0x4d   : >> { %526 = vmatpush1.bf16.msra.mxu0 %v1844_v6  ;;  %s759_s26 = scalar_lea.vmem %s1774_s20, %s1282_s19 [#allocation3] }
  0x4e   : >> { %527 = vmatprep.subr.bf16.mxu0 %v1850_v7  ;;  %1327 = vmatpush3.bf16.msra.mxu1 %v1855_v8  ;;  %s869_s27 = scalar_select %p868_p1, 1, 0 }
  0x4f   : >> { %1328 = vmatprep.subr.bf16.mxu1 %v2142_v63 }
  0x51   : >> { %528 = vmatpush1.bf16.msra.mxu0 %v1860_v9 }
  0x52   : >> { %529 = vmatprep.subr.bf16.mxu0 %v1866_v10  ;;  %1329 = vmatpush3.bf16.msra.mxu1 %v1871_v11 }
  0x53   : >> { %1330 = vmatprep.subr.bf16.mxu1 %v2142_v63 }
  0x55   : >> { %530 = vmatpush1.bf16.msra.mxu0 %v1876_v12 }
  0x56   : >> { %531 = vmatprep.subr.bf16.mxu0 %v1882_v13  ;;  %1331 = vmatpush3.bf16.msra.mxu1 %v1887_v14 }
  0x57   : >> { %1332 = vmatprep.subr.bf16.mxu1 %v2142_v63 }
  0x59   : >> { %532 = vmatpush1.bf16.msra.mxu0 %v1892_v15 }
  0x5a   : >> { %533 = vmatprep.subr.bf16.mxu0 %v1898_v16  ;;  %1333 = vmatpush3.bf16.msra.mxu1 %v1903_v26 }
  0x5b   : >> { %1334 = vmatprep.subr.bf16.mxu1 %v2142_v63 }
  0x5d   : >> { %534 = vmatpush1.bf16.msra.mxu0 %v1908_v39 }
  0x5e   : >> { %642 = vmatprep.subr.bf16.mxu0 %v1791_v58  ;;  %1335 = vmatpush3.bf16.msra.mxu1 %v1917_v44 }
  0x5f   : >> { %1340 = vmatprep.subr.bf16.mxu1 %v2142_v63 }
  0x60   : >> { %552 = vmatmul.mubr.bf16.vlgmr.msra.gmra.mxu0 %v390_v40 }
  0x61   : >> { %643 = vmatpush1.bf16.msra.mxu0 %v1795_v59  ;;  %674 = vmatprep.mubr.bf16.mxu0 %v2138_v1 }
  0x62   : >> { %644 = vmatprep.subr.bf16.mxu0 %v1799_v60  ;;  %1337 = vmatmul.mubr.bf16.vlgmr.msra.gmra.mxu1 %v390_v40  ;;  %v387_v40 = vunpack.c.l.bf16 %v385_v53  ;;  %v2187_v53 = vmov 0  }
  0x63   : >> { %1341 = vmatpush3.bf16.msra.mxu1 %v1815_v0  ;;  %1356 = vmatprep.mubr.msk.bf16.mxu1 %vm1562_vm0, %v2142_v63 }
  0x64   : >> { %1342 = vmatprep.subr.bf16.mxu1 %v2142_v63 }
  0x65   : >> { %645 = vmatpush1.bf16.msra.mxu0 %v1805_v61 }
  0x66   : >> { %646 = vmatprep.subr.bf16.mxu0 %v1810_v62 }
  0x67   : >> { %1343 = vmatpush3.bf16.msra.mxu1 %v1821_v2 }
  0x68   : >> { %1344 = vmatprep.subr.bf16.mxu1 %v2142_v63 }
  0x69   : >> { %647 = vmatpush1.bf16.msra.mxu0 %v1826_v3 }
  0x6a   : >> { %648 = vmatprep.subr.bf16.mxu0 %v1832_v4 }
  0x6b   : >> { %1345 = vmatpush3.bf16.msra.mxu1 %v1839_v5 }
  0x6c   : >> { %1346 = vmatprep.subr.bf16.mxu1 %v2142_v63 }
  0x6d   : >> { %649 = vmatpush1.bf16.msra.mxu0 %v1844_v6 }
  0x6e   : >> { %650 = vmatprep.subr.bf16.mxu0 %v1850_v7 }
  0x6f   : >> { %1347 = vmatpush3.bf16.msra.mxu1 %v1855_v8 }
  0x70   : >> { %1348 = vmatprep.subr.bf16.mxu1 %v2142_v63 }
  0x71   : >> { %651 = vmatpush1.bf16.msra.mxu0 %v1860_v9 }
  0x72   : >> { %652 = vmatprep.subr.bf16.mxu0 %v1866_v10 }
  0x73   : >> { %1349 = vmatpush3.bf16.msra.mxu1 %v1871_v11 }
  0x74   : >> { %1350 = vmatprep.subr.bf16.mxu1 %v2142_v63 }
  0x75   : >> { %653 = vmatpush1.bf16.msra.mxu0 %v1876_v12 }
  0x76   : >> { %654 = vmatprep.subr.bf16.mxu0 %v1882_v13 }
  0x77   : >> { %1351 = vmatpush3.bf16.msra.mxu1 %v1887_v14 }
  0x78   : >> { %1352 = vmatprep.subr.bf16.mxu1 %v2142_v63 }
  0x79   : >> { %655 = vmatpush1.bf16.msra.mxu0 %v1892_v15 }
  0x7a   : >> { %656 = vmatprep.subr.bf16.mxu0 %v1898_v16 }
  0x7b   : >> { %1353 = vmatpush3.bf16.msra.mxu1 %v1903_v26 }
  0x7c   : >> { %1354 = vmatprep.subr.bf16.mxu1 %v2142_v63 }
  0x7d   : >> { %657 = vmatpush1.bf16.msra.mxu0 %v1908_v39 }
  0x7e   : >> { %765 = vmatprep.subr.bf16.mxu0 %v1791_v58 }
  0x7f   : >> { %1355 = vmatpush3.bf16.msra.mxu1 %v1917_v44 }
  0x80   : >> { %1360 = vmatprep.subr.bf16.mxu1 %v2142_v63 }
 0x120   : >> { %v553_v1 = vpop.f32.mrf.mxu0 }
 0x121   : >> { %v554_v17 = vadd.f32 %v553_v1, %v1767_v54 }
 0x122   : >> { %v555_v18 = vpop.f32.mrf.mxu0  ;;  %v594_v20 = vpop.f32.mrf.mxu1 }
 0x123   : >> { %v600_v19 = vadd.f32 %v554_v17, %v387_v40  ;;  %v556_v23 = vadd.f32 %v555_v18, %v1769_v55  ;;  %v386_v17 = vld [vmem:[%s384_s28 + $0x8] sm:$0xf]  ;;  %s1270_s28 = sshll.u32 %s2199_s18, 2 }
 0x124   : >> { %v557_v63 = vpop.f32.mrf.mxu0  ;;  %v1338_v24 = vpop.f32.mrf.mxu1 }
 0x125   : >> { %v1260_v21 = vmul.f32 -1.442695, %v600_v19  ;;  %v607_v28 = vadd.f32 %v556_v23, %v388_v22  ;;  %v595_v19 = vadd.f32 %v594_v20, %v1771_v56  ;;  %v389_v63 = vunpack.c.l.bf16 %v386_v17 }
 0x126   : >> { %v558_v25 = vpop.f32.mrf.mxu0  ;;  %v597_v27 = vpop.f32.mrf.mxu1 }
 0x127   : >> { %1464 = vpow2.f32 %v1260_v21  ;;  %v1261_v30 = vmul.f32 -1.442695, %v607_v28  ;;  %v624_v25 = vstv %s623_s29  ;;  %s875_s29 = scalar_lea.vmem %s1777_s23, %s1270_s28 [#allocation4] }
 0x128   : >> { %v1339_v29 = vpop.f32.mrf.mxu1  ;;  %vm625_vm1 = vcmp.eq.s32.totalorder %v624_v25, 1 }
 0x129   : >> { %1466 = vpow2.f32 %v1261_v30 }
 0x134   : >> { %v1465_v31 = vpop.eup %1464 }
 0x135   : >> { %v604_v32 = vadd.f32 1.0, %v1465_v31 }
 0x136   : >> { %v1467_v1 = vpop.eup %1466 }
 0x137   : >> { %1468 = vrcp.f32 %v604_v32  ;;  %v611_v40 = vadd.f32 1.0, %v1467_v1  ;;  %v2186_v32 = vmov 0.0  }
 0x139   : >> { %1470 = vrcp.f32 %v611_v40 }
 0x144   : >> { %v1469_v18 = vpop.eup %1468 }
 0x145   : >> { %v614_v21 = vmul.f32 %v1469_v18, %v595_v19 }
 0x146   : >> { %v1471_v22 = vpop.eup %1470 }
 0x147   : >> { %v615_v24 = vadd.f32 %v614_v21, %v389_v63  ;;  %v617_v23 = vsub.f32 1.0, %v1471_v22  ;;  %v619_v29 = vmul.f32 %v1554_v57, %v1471_v22 }
 0x149   : >> { %1472 = vtanh.f32 %v615_v24 }
 0x156   : >> { %v1473_v27 = vpop.eup %1472 }
 0x157   : >> { %v618_v28 = vmul.f32 %v1473_v27, %v617_v23 }
 0x159   : >> { %v620_v20 = vadd.f32 %v619_v29, %v618_v28 }
 0x15b   : >> { %v1977_v30 = vsel %vm625_vm1, %v620_v20, %v1554_v57  ;;  %v637_v57 = vld [vmem:[%s636_s8] sm:$0xff] }
 0x15c   : >> { %v627_v31 = vpack.c.bf16 %v1977_v30, %v1977_v30  ;;  %v639_v1 = vunpack.c.l.bf16 %v637_v57  ;;  %v640_v23 = vunpack.c.h.bf16 %v637_v57 }
 0x15e   : >> { %630 = vst [vmem:[%s629_s4] sm:$0xf] %v627_v31  ;;  %675 = vmatmul.mubr.bf16.vlgmr.msra.gmra.mxu0 %v627_v31  ;;  %1357 = vmatmul.mubr.bf16.vlgmr.msra.gmra.mxu1 %v627_v31  ;;  %s878_s4 = ssub.s32 4, %s1960_s25 }
 0x15f   : >> { %766 = vmatpush1.bf16.msra.mxu0 %v1795_v59  ;;  %1361 = vmatpush3.bf16.msra.mxu1 %v1815_v0  ;;  %s2201_s4 = smov (!%p313_p12, %s878_s4), %s877_s30 }
 0x160   : >> { %767 = vmatprep.subr.bf16.mxu0 %v1799_v60  ;;  %1362 = vmatprep.subr.bf16.mxu1 %v2186_v32  ;;  %s1283_s5 = smul.u32 12, %s2201_s4  ;;  %p991_p2 = scmp.lt.s32.totalorder %s2201_s4, 7 }
 0x161   : >> { %797 = vmatprep.mubr.bf16.mxu0 %v2187_v53  ;;  %1376 = vmatprep.mubr.msk.bf16.mxu1 %vm1562_vm0, %v2186_v32  ;;  %s1274_s7 = sshll.u32 %s2201_s4, 2 }
 0x162   : >> { %s882_s6 = scalar_lea.vmem %s1774_s20, %s1283_s5 [#allocation3]  ;;  %s998_s8 = scalar_lea.vmem %s1777_s23, %s1274_s7 [#allocation4] }
 0x163   : >> { %768 = vmatpush1.bf16.msra.mxu0 %v1805_v61  ;;  %1363 = vmatpush3.bf16.msra.mxu1 %v1821_v2  ;;  %s992_s25 = scalar_select %p991_p2, 1, 0 }
 0x164   : >> { %769 = vmatprep.subr.bf16.mxu0 %v1810_v62  ;;  %1364 = vmatprep.subr.bf16.mxu1 %v2186_v32 }
 0x167   : >> { %770 = vmatpush1.bf16.msra.mxu0 %v1826_v3  ;;  %1365 = vmatpush3.bf16.msra.mxu1 %v1839_v5 }
 0x168   : >> { %771 = vmatprep.subr.bf16.mxu0 %v1832_v4  ;;  %1366 = vmatprep.subr.bf16.mxu1 %v2186_v32 }
 0x16b   : >> { %772 = vmatpush1.bf16.msra.mxu0 %v1844_v6  ;;  %1367 = vmatpush3.bf16.msra.mxu1 %v1855_v8 }
 0x16c   : >> { %773 = vmatprep.subr.bf16.mxu0 %v1850_v7  ;;  %1368 = vmatprep.subr.bf16.mxu1 %v2186_v32 }
 0x16f   : >> { %774 = vmatpush1.bf16.msra.mxu0 %v1860_v9  ;;  %1369 = vmatpush3.bf16.msra.mxu1 %v1871_v11 }
 0x170   : >> { %775 = vmatprep.subr.bf16.mxu0 %v1866_v10  ;;  %1370 = vmatprep.subr.bf16.mxu1 %v2186_v32 }
 0x173   : >> { %776 = vmatpush1.bf16.msra.mxu0 %v1876_v12  ;;  %1371 = vmatpush3.bf16.msra.mxu1 %v1887_v14 }
 0x174   : >> { %777 = vmatprep.subr.bf16.mxu0 %v1882_v13  ;;  %1372 = vmatprep.subr.bf16.mxu1 %v2186_v32 }
 0x177   : >> { %778 = vmatpush1.bf16.msra.mxu0 %v1892_v15  ;;  %1373 = vmatpush3.bf16.msra.mxu1 %v1903_v26 }
 0x178   : >> { %779 = vmatprep.subr.bf16.mxu0 %v1898_v16  ;;  %1374 = vmatprep.subr.bf16.mxu1 %v2186_v32 }
 0x17b   : >> { %780 = vmatpush1.bf16.msra.mxu0 %v1908_v39  ;;  %1375 = vmatpush3.bf16.msra.mxu1 %v1917_v44 }
 0x17c   : >> { %888 = vmatprep.subr.bf16.mxu0 %v1791_v58  ;;  %1380 = vmatprep.subr.bf16.mxu1 %v2186_v32 }
 0x21e   : >> { %v676_v17 = vpop.f32.mrf.mxu0  ;;  %v717_v40 = vpop.f32.mrf.mxu1 }
 0x21f   : >> { %v677_v19 = vadd.f32 %v676_v17, %v1767_v54 }
 0x220   : >> { %v678_v63 = vpop.f32.mrf.mxu0  ;;  %v1358_v18 = vpop.f32.mrf.mxu1 }
 0x221   : >> { %v723_v21 = vadd.f32 %v677_v19, %v639_v1  ;;  %v679_v25 = vadd.f32 %v678_v63, %v1769_v55  ;;  %v641_v1 = vunpack.c.l.bf16 %v638_v34  ;;  %v718_v19 = vadd.f32 %v717_v40, %v1771_v56 }
 0x222   : >> { %v680_v58 = vpop.f32.mrf.mxu0  ;;  %v720_v24 = vpop.f32.mrf.mxu1 }
 0x223   : >> { %v1264_v22 = vmul.f32 -1.442695, %v723_v21  ;;  %v730_v29 = vadd.f32 %v679_v25, %v640_v23 }
 0x224   : >> { %v681_v27 = vpop.f32.mrf.mxu0  ;;  %v1359_v28 = vpop.f32.mrf.mxu1 }
 0x225   : >> { %1474 = vpow2.f32 %v1264_v22  ;;  %v1265_v20 = vmul.f32 -1.442695, %v730_v29  ;;  %v747_v22 = vstv %s746_s9 }
 0x226   : >> { %vm748_vm2 = vcmp.eq.s32.totalorder %v747_v22, 1 }
 0x227   : >> { %1476 = vpow2.f32 %v1265_v20 }
 0x232   : >> { %v1475_v31 = vpop.eup %1474 }
 0x233   : >> { %v727_v33 = vadd.f32 1.0, %v1475_v31  ;;  %v870_v31 = vstv %s869_s27 }
 0x234   : >> { %v1477_v17 = vpop.eup %1476  ;;  %vm871_vm3 = vcmp.eq.s32.totalorder %v870_v31, 1 }
 0x235   : >> { %1478 = vrcp.f32 %v727_v33  ;;  %v734_v18 = vadd.f32 1.0, %v1477_v17 }
 0x237   : >> { %1480 = vrcp.f32 %v734_v18 }
 0x242   : >> { %v1479_v57 = vpop.eup %1478 }
 0x243   : >> { %v737_v21 = vmul.f32 %v1479_v57, %v718_v19 }
 0x244   : >> { %v1481_v58 = vpop.eup %1480 }
 0x245   : >> { %v738_v63 = vadd.f32 %v737_v21, %v641_v1  ;;  %v740_v24 = vsub.f32 1.0, %v1481_v58  ;;  %v742_v25 = vmul.f32 %v1481_v58, %v1977_v30 }
 0x247   : >> { %1482 = vtanh.f32 %v738_v63  ;;  %v883_v63 = vld [vmem:[%s882_s6] sm:$0xff] }
 0x248   : >> { %v885_v58 = vunpack.c.l.bf16 %v883_v63 }
 0x254   : >> { %v1483_v23 = vpop.eup %1482 }
 0x255   : >> { %v741_v33 = vmul.f32 %v1483_v23, %v740_v24 }
 0x257   : >> { %v743_v34 = vadd.f32 %v742_v25, %v741_v33 }
 0x259   : >> { %v2032_v40 = vsel %vm748_vm2, %v743_v34, %v1977_v30 }
 0x25a   : >> { %v750_v27 = vpack.c.bf16 %v2032_v40, %v2032_v40 }
 0x25c   : >> { %753 = vst [vmem:[%s752_s11] sm:$0xf] %v750_v27  ;;  %798 = vmatmul.mubr.bf16.vlgmr.msra.gmra.mxu0 %v750_v27  ;;  %1377 = vmatmul.mubr.bf16.vlgmr.msra.gmra.mxu1 %v750_v27 }
 0x25d   : >> { %889 = vmatpush1.bf16.msra.mxu0 %v1795_v59  ;;  %1381 = vmatpush3.bf16.msra.mxu1 %v1815_v0  ;;  %v760_v59 = vld [vmem:[%s759_s26] sm:$0xff] }
 0x25e   : >> { %890 = vmatprep.subr.bf16.mxu0 %v1799_v60  ;;  %1382 = vmatprep.subr.bf16.mxu1 %v2186_v32  ;;  %v762_v60 = vunpack.c.l.bf16 %v760_v59 }
 0x25f   : >> { %920 = vmatprep.mubr.bf16.mxu0 %v2187_v53  ;;  %1396 = vmatprep.mubr.msk.bf16.mxu1 %vm1562_vm0, %v2186_v32 }
 0x261   : >> { %891 = vmatpush1.bf16.msra.mxu0 %v1805_v61  ;;  %1383 = vmatpush3.bf16.msra.mxu1 %v1821_v2 }
 0x262   : >> { %892 = vmatprep.subr.bf16.mxu0 %v1810_v62  ;;  %1384 = vmatprep.subr.bf16.mxu1 %v2186_v32 }
 0x265   : >> { %893 = vmatpush1.bf16.msra.mxu0 %v1826_v3  ;;  %1385 = vmatpush3.bf16.msra.mxu1 %v1839_v5 }
 0x266   : >> { %894 = vmatprep.subr.bf16.mxu0 %v1832_v4  ;;  %1386 = vmatprep.subr.bf16.mxu1 %v2186_v32 }
 0x269   : >> { %895 = vmatpush1.bf16.msra.mxu0 %v1844_v6  ;;  %1387 = vmatpush3.bf16.msra.mxu1 %v1855_v8  ;;  %v763_v8 = vunpack.c.h.bf16 %v760_v59 }
 0x26a   : >> { %896 = vmatprep.subr.bf16.mxu0 %v1850_v7  ;;  %1388 = vmatprep.subr.bf16.mxu1 %v2186_v32 }
 0x26d   : >> { %897 = vmatpush1.bf16.msra.mxu0 %v1860_v9  ;;  %1389 = vmatpush3.bf16.msra.mxu1 %v1871_v11 }
 0x26e   : >> { %898 = vmatprep.subr.bf16.mxu0 %v1866_v10  ;;  %1390 = vmatprep.subr.bf16.mxu1 %v2186_v32 }
 0x271   : >> { %899 = vmatpush1.bf16.msra.mxu0 %v1876_v12  ;;  %1391 = vmatpush3.bf16.msra.mxu1 %v1887_v14 }
 0x272   : >> { %900 = vmatprep.subr.bf16.mxu0 %v1882_v13  ;;  %1392 = vmatprep.subr.bf16.mxu1 %v2186_v32 }
 0x275   : >> { %901 = vmatpush1.bf16.msra.mxu0 %v1892_v15  ;;  %1393 = vmatpush3.bf16.msra.mxu1 %v1903_v26  ;;  %v761_v26 = vld [vmem:[%s759_s26 + $0x8] sm:$0xf] }
 0x276   : >> { %902 = vmatprep.subr.bf16.mxu0 %v1898_v16  ;;  %1394 = vmatprep.subr.bf16.mxu1 %v2186_v32 }
 0x279   : >> { %903 = vmatpush1.bf16.msra.mxu0 %v1908_v39  ;;  %1395 = vmatpush3.bf16.msra.mxu1 %v1917_v44  ;;  %v764_v44 = vunpack.c.l.bf16 %v761_v26 }
 0x31c   : >> { %v799_v61 = vpop.f32.mrf.mxu0  ;;  %v840_v62 = vpop.f32.mrf.mxu1 }
 0x31d   : >> { %v800_v0 = vadd.f32 %v799_v61, %v1767_v54  ;;  %v841_v30 = vadd.f32 %v840_v62, %v1771_v56 }
 0x31e   : >> { %v801_v2 = vpop.f32.mrf.mxu0  ;;  %v1378_v3 = vpop.f32.mrf.mxu1 }
 0x31f   : >> { %v846_v4 = vadd.f32 %v800_v0, %v762_v60  ;;  %v802_v9 = vadd.f32 %v801_v2, %v1769_v55  ;;  %v886_v60 = vunpack.c.h.bf16 %v883_v63 }
 0x320   : >> { %v803_v5 = vpop.f32.mrf.mxu0  ;;  %v843_v6 = vpop.f32.mrf.mxu1 }
 0x321   : >> { %v1268_v7 = vmul.f32 -1.442695, %v846_v4  ;;  %v853_v12 = vadd.f32 %v802_v9, %v763_v8 }
 0x322   : >> { %v804_v10 = vpop.f32.mrf.mxu0  ;;  %v1379_v11 = vpop.f32.mrf.mxu1 }
 0x323   : >> { %1484 = vpow2.f32 %v1268_v7  ;;  %v1269_v13 = vmul.f32 -1.442695, %v853_v12  ;;  %v884_v7 = vld [vmem:[%s882_s6 + $0x8] sm:$0xf] }
 0x324   : >> { %v887_v9 = vunpack.c.l.bf16 %v884_v7 }
 0x325   : >> { %1486 = vpow2.f32 %v1269_v13 }
 0x330   : >> { %v1485_v14 = vpop.eup %1484 }
 0x331   : >> { %v850_v15 = vadd.f32 1.0, %v1485_v14 }
 0x332   : >> { %v1487_v16 = vpop.eup %1486 }
 0x333   : >> { %1488 = vrcp.f32 %v850_v15  ;;  %v857_v39 = vadd.f32 1.0, %v1487_v16  ;;  %v993_v15 = vstv %s992_s25 }
 0x334   : >> { %vm994_vm4 = vcmp.eq.s32.totalorder %v993_v15, 1 }
 0x335   : >> { %1490 = vrcp.f32 %v857_v39 }
 0x340   : >> { %v1489_v32 = vpop.eup %1488 }
 0x341   : >> { %v860_v53 = vmul.f32 %v1489_v32, %v841_v30 }
 0x342   : >> { %v1491_v29 = vpop.eup %1490 }
 0x343   : >> { %v861_v28 = vadd.f32 %v860_v53, %v764_v44  ;;  %v863_v20 = vsub.f32 1.0, %v1491_v29  ;;  %v865_v1 = vmul.f32 %v1491_v29, %v2032_v40 }
 0x345   : >> { %1492 = vtanh.f32 %v861_v28 }
 0x352   : >> { %v1493_v17 = vpop.eup %1492 }
 0x353   : >> { %v864_v18 = vmul.f32 %v1493_v17, %v863_v20 }
 0x355   : >> { %v866_v19 = vadd.f32 %v865_v1, %v864_v18 }
 0x357   : >> { %v872_v57 = vsel %vm871_vm3, %v866_v19, %v2032_v40 }
 0x358   : >> { %v873_v21 = vpack.c.bf16 %v872_v57, %v872_v57 }
 0x35a   : >> { %876 = vst [vmem:[%s875_s29] sm:$0xf] %v873_v21  ;;  %921 = vmatmul.mubr.bf16.vlgmr.msra.gmra.mxu0 %v873_v21  ;;  %1397 = vmatmul.mubr.bf16.vlgmr.msra.gmra.mxu1 %v873_v21 }
 0x41a   : >> { %v922_v24 = vpop.f32.mrf.mxu0  ;;  %v963_v22 = vpop.f32.mrf.mxu1 }
 0x41b   : >> { %v923_v23 = vadd.f32 %v922_v24, %v1767_v54  ;;  %v964_v10 = vadd.f32 %v963_v22, %v1771_v56 }
 0x41c   : >> { %v924_v33 = vpop.f32.mrf.mxu0  ;;  %v1398_v25 = vpop.f32.mrf.mxu1 }
 0x41d   : >> { %v969_v34 = vadd.f32 %v923_v23, %v885_v58  ;;  %v925_v61 = vadd.f32 %v924_v33, %v1769_v55 }
 0x41e   : >> { %v926_v40 = vpop.f32.mrf.mxu0  ;;  %v966_v27 = vpop.f32.mrf.mxu1 }
 0x41f   : >> { %v1272_v59 = vmul.f32 -1.442695, %v969_v34  ;;  %v976_v2 = vadd.f32 %v925_v61, %v886_v60 }
 0x420   : >> { %v927_v62 = vpop.f32.mrf.mxu0  ;;  %v1399_v0 = vpop.f32.mrf.mxu1 }
 0x421   : >> { %1494 = vpow2.f32 %v1272_v59  ;;  %v1273_v3 = vmul.f32 -1.442695, %v976_v2 }
 0x423   : >> { %1496 = vpow2.f32 %v1273_v3 }
 0x42e   : >> { %v1495_v4 = vpop.eup %1494 }
 0x42f   : >> { %v973_v5 = vadd.f32 1.0, %v1495_v4 }
 0x430   : >> { %v1497_v6 = vpop.eup %1496 }
 0x431   : >> { %1498 = vrcp.f32 %v973_v5  ;;  %v980_v8 = vadd.f32 1.0, %v1497_v6 }
 0x433   : >> { %1500 = vrcp.f32 %v980_v8 }
 0x43e   : >> { %v1499_v11 = vpop.eup %1498 }
 0x43f   : >> { %v983_v12 = vmul.f32 %v1499_v11, %v964_v10 }
 0x440   : >> { %v1501_v14 = vpop.eup %1500 }
 0x441   : >> { %v984_v13 = vadd.f32 %v983_v12, %v887_v9  ;;  %v986_v16 = vsub.f32 1.0, %v1501_v14  ;;  %v988_v44 = vmul.f32 %v1501_v14, %v872_v57 }
 0x443   : >> { %1502 = vtanh.f32 %v984_v13 }
 0x450   : >> { %v1503_v26 = vpop.eup %1502 }
 0x451   : >> { %v987_v39 = vmul.f32 %v1503_v26, %v986_v16 }
 0x453   : >> { %v989_v30 = vadd.f32 %v988_v44, %v987_v39 }
 0x454   : > { %376 = sbr.rel (!%p374_p3) target bundleno = 62 (0x3e), region = 165 }
 0x455   : >> { %v995_v57 = vsel %vm994_vm4, %v989_v30, %v872_v57  }
 0x456   : >> { %v996_v32 = vpack.c.bf16 %v995_v57, %v995_v57 }
 0x458   : >> { %999 = vst [vmem:[%s998_s8] sm:$0xf] %v996_v32 }
 0x459   : > { %1007 = sbr.rel (!%p1618_p6) target bundleno = 1125 (0x465), region = 73  ;;  %s1276_s9 = sshll.u32 (%p1618_p6), %s1542_s14, 2 }
 0x45a   : > { %s1016_s24 = scalar_lea.vmem (%p1618_p6), %s2137_s3, %s1276_s9 }
 0x45f   : > { %v1033_v53 = vld [vmem:[%s1777_s23] sm:$0xf]  ;;  %v1035_v28 = vld [vmem:[%s1777_s23 + $0x4] sm:$0xf]  ;;  %v1037_v29 = vld [vmem:[%s1777_s23 + $0x8] sm:$0xf] }
 0x460   : > { %v1039_v35 = vld [vmem:[%s1777_s23 + $0xc] sm:$0xf]  ;;  %v1041_v36 = vld [vmem:[%s1777_s23 + $0x10] sm:$0xf]  ;;  %1034 = vst [vmem:[%s1016_s24] sm:$0xf] %v1033_v53 }
 0x461   : > { %1036 = vst [vmem:[%s1016_s24 + $0x8] sm:$0xf] %v1035_v28  ;;  %1038 = vst [vmem:[%s1016_s24 + $0x10] sm:$0xf] %v1037_v29  ;;  %v1043_v37 = vld [vmem:[%s1777_s23 + $0x14] sm:$0xf] }
 0x462   : > { %1040 = vst [vmem:[%s1016_s24 + $0x18] sm:$0xf] %v1039_v35  ;;  %1042 = vst [vmem:[%s1016_s24 + $0x20] sm:$0xf] %v1041_v36  ;;  %v1045_v38 = vld [vmem:[%s1777_s23 + $0x18] sm:$0xf] }
 0x463   : > { %v1047_v41 = vld [vmem:[%s1777_s23 + $0x1c] sm:$0xf]  ;;  %1044 = vst [vmem:[%s1016_s24 + $0x28] sm:$0xf] %v1043_v37  ;;  %1046 = vst [vmem:[%s1016_s24 + $0x30] sm:$0xf] %v1045_v38 }
 0x464   : > { %1048 = vst [vmem:[%s1016_s24 + $0x38] sm:$0xf] %v1047_v41 }
 0x465 PF: > { %s13_s16 = sadd.s32 1, %s1550_s16   ;;  %s2188_s12 = smov %s1538_s13 }
 0x466   : > { %p10_p4 = scmp.ge.s32.totalorder %s13_s16, 4   ;;  %s2189_s13 = smov %s1623_s22 }
 0x467   : > { %s2190_s14 = smov %s1546_s15  ;;  %s2191_s15 = smov %s2193_s17 }
 0x468   :  { %12 = sbr.rel (!%p10_p4) target bundleno = 3 (0x3), region = 176 }

// kernel: gru_encoder_forward.11
= control target key start
LH: loop header
LB: loop body
LE: loop exit
PB: predicated region body
PF: predicated region fallthrough
CT: control target
= control target key end

     0   :  { %s503_s1 = inlined_call_operand.vmem [shape: bf16[256,128], index: 1, kind: input, shape index: {}]   ;;  %s504_s0 = inlined_call_operand.vmem [shape: bf16[64,256], index: 0, kind: input, shape index: {}]   ;;  %s505_s2 = inlined_call_operand.vmem [shape: f32[1,128], index: 2, kind: input, shape index: {}]   ;;  %s506_s3 = inlined_call_operand.vmem [shape: f32[64,128], index: 3, kind: output, shape index: {}]  }
   0x1   :  { %v356_v0 = vld [vmem:[%s503_s1 + $0x78] sm:$0xff]   ;;  %v358_v2 = vld [vmem:[%s503_s1 + $0x70] sm:$0xff]   ;;  %v360_v4 = vld [vmem:[%s503_s1 + $0x68] sm:$0xff]  }
   0x2   :  { %v357_v1 = vld [vmem:[%s503_s1 + $0x38] sm:$0xff]   ;;  %300 = vmatprep.subr.bf16.mxu0 %v356_v0  ;;  %340 = vmatprep.subr.bf16.mxu1 %v356_v0  ;;  %v359_v3 = vld [vmem:[%s503_s1 + $0x30] sm:$0xff]   ;;  %v361_v5 = vld [vmem:[%s503_s1 + $0x28] sm:$0xff]  }
   0x3   :  { %301 = vmatpush3.bf16.msra.mxu0 %v357_v1  ;;  %348 = vmatpush3.bf16.msra.mxu1 %v357_v1  ;;  %v362_v6 = vld [vmem:[%s503_s1 + $0x60] sm:$0xff]   ;;  %v364_v8 = vld [vmem:[%s503_s1 + $0x58] sm:$0xff]   ;;  %v366_v10 = vld [vmem:[%s503_s1 + $0x50] sm:$0xff]  }
   0x4   :  { %302 = vmatprep.subr.bf16.mxu0 %v358_v2  ;;  %341 = vmatprep.subr.bf16.mxu1 %v358_v2  ;;  %v363_v7 = vld [vmem:[%s503_s1 + $0x20] sm:$0xff]   ;;  %v365_v9 = vld [vmem:[%s503_s1 + $0x18] sm:$0xff]   ;;  %v367_v13 = vld [vmem:[%s503_s1 + $0x10] sm:$0xff]  }
   0x5   :  { %v374_v11 = vld [vmem:[%s504_s0 + $0x4] ss:$8 sps:$4 sm:$0xff]   ;;  %v372_v18 = vld [vmem:[%s504_s0] ss:$8 sps:$4 sm:$0xff]   ;;  %v378_v20 = vld [vmem:[%s504_s0 + $0x14] ss:$8 sps:$4 sm:$0xff]  }
   0x6   :  { %v377_v12 = vld [vmem:[%s504_s0 + $0x24] ss:$8 sps:$4 sm:$0xff]   ;;  %230 = vmatprep.mubr.bf16.mxu0 %v374_v11  ;;  %v375_v19 = vld [vmem:[%s504_s0 + $0x20] ss:$8 sps:$4 sm:$0xff]   ;;  %v380_v21 = vld [vmem:[%s504_s0 + $0x34] ss:$8 sps:$4 sm:$0xff]  }
   0x7   :  { %303 = vmatpush3.bf16.msra.mxu0 %v359_v3  ;;  %349 = vmatpush3.bf16.msra.mxu1 %v359_v3  ;;  %v368_v14 = vld [vmem:[%s503_s1 + $0x48] sm:$0xff]   ;;  %v370_v16 = vld [vmem:[%s503_s1 + $0x40] sm:$0xff]   ;;  %v382_v22 = vld [vmem:[%s504_s0 + $0x10] ss:$8 sps:$4 sm:$0xff]  }
   0x8   :  { %304 = vmatprep.subr.bf16.mxu0 %v360_v4  ;;  %342 = vmatprep.subr.bf16.mxu1 %v360_v4  ;;  %v369_v15 = vld [vmem:[%s503_s1 + $0x8] sm:$0xff]   ;;  %v371_v17 = vld [vmem:[%s503_s1] sm:$0xff]   ;;  %v383_v23 = vld [vmem:[%s504_s0 + $0x30] ss:$8 sps:$4 sm:$0xff]  }
   0x9   :  { %246 = vmatprep.mubr.bf16.mxu1 %v377_v12  ;;  %v275_v26 = vld [vmem:[%s505_s2] ss:$0 sm:$0xff] }
   0xb   :  { %305 = vmatpush3.bf16.msra.mxu0 %v361_v5  ;;  %350 = vmatpush3.bf16.msra.mxu1 %v361_v5 }
   0xc   :  { %306 = vmatprep.subr.bf16.mxu0 %v362_v6  ;;  %343 = vmatprep.subr.bf16.mxu1 %v362_v6 }
   0xf   :  { %307 = vmatpush3.bf16.msra.mxu0 %v363_v7  ;;  %351 = vmatpush3.bf16.msra.mxu1 %v363_v7 }
  0x10   :  { %308 = vmatprep.subr.bf16.mxu0 %v364_v8  ;;  %344 = vmatprep.subr.bf16.mxu1 %v364_v8 }
  0x13   :  { %309 = vmatpush3.bf16.msra.mxu0 %v365_v9  ;;  %352 = vmatpush3.bf16.msra.mxu1 %v365_v9 }
  0x14   :  { %310 = vmatprep.subr.bf16.mxu0 %v366_v10  ;;  %345 = vmatprep.subr.bf16.mxu1 %v366_v10 }
  0x17   :  { %311 = vmatpush3.bf16.msra.mxu0 %v367_v13  ;;  %353 = vmatpush3.bf16.msra.mxu1 %v367_v13 }
  0x18   :  { %312 = vmatprep.subr.bf16.mxu0 %v368_v14  ;;  %346 = vmatprep.subr.bf16.mxu1 %v368_v14 }
  0x1b   :  { %313 = vmatpush3.bf16.msra.mxu0 %v369_v15  ;;  %354 = vmatpush3.bf16.msra.mxu1 %v369_v15 }
  0x1c   :  { %314 = vmatprep.subr.bf16.mxu0 %v370_v16  ;;  %347 = vmatprep.subr.bf16.mxu1 %v370_v16 }
  0x1f   :  { %315 = vmatpush3.bf16.msra.mxu0 %v371_v17  ;;  %355 = vmatpush3.bf16.msra.mxu1 %v371_v17 }
  0x22   :  { %231 = vmatmul.mubr.bf16.vlgmr.msra.gmra.mxu0 %v372_v18  ;;  %247 = vmatmul.mubr.bf16.vlgmr.msra.gmra.mxu1 %v375_v19 }
  0x23   :  { %238 = vmatprep.mubr.bf16.mxu0 %v378_v20  ;;  %254 = vmatprep.mubr.bf16.mxu1 %v380_v21 }
  0x2a   :  { %239 = vmatmul.mubr.bf16.gmra.mxu0 %v382_v22  ;;  %255 = vmatmul.mubr.bf16.gmra.mxu1 %v383_v23 }
  0xe2   :  { %v316_v24 = vpop.f32.mrf.mxu0  ;;  %v328_v25 = vpop.f32.mrf.mxu1 }
  0xe4   :  { %v317_v27 = vpop.f32.mrf.mxu0  ;;  %v329_v28 = vpop.f32.mrf.mxu1 }
  0xe5   :  { %v318_v29 = vadd.f32 %v317_v27, %v316_v24  ;;  %v330_v30 = vadd.f32 %v329_v28, %v328_v25 }
  0xe6   :  { %v319_v31 = vpop.f32.mrf.mxu0  ;;  %v331_v32 = vpop.f32.mrf.mxu1 }
  0xe7   :  { %v233_v33 = vadd.f32 %v318_v29, %v275_v26  ;;  %v249_v34 = vadd.f32 %v330_v30, %v275_v26 }
  0xe8   :  { %v320_v35 = vpop.f32.mrf.mxu0  ;;  %v332_v36 = vpop.f32.mrf.mxu1 }
  0xe9   :  { %263 = vst [vmem:[%s506_s3] sm:$0xff] %v233_v33  ;;  %267 = vst [vmem:[%s506_s3 + $0x20] sm:$0xff] %v249_v34  ;;  %v321_v37 = vadd.f32 %v320_v35, %v319_v31  ;;  %v333_v38 = vadd.f32 %v332_v36, %v331_v32 }
  0xea   :  { %v322_v39 = vpop.f32.mrf.mxu0  ;;  %v334_v40 = vpop.f32.mrf.mxu1 }
  0xeb   :  { %v236_v41 = vadd.f32 %v321_v37, %v275_v26  ;;  %v252_v42 = vadd.f32 %v333_v38, %v275_v26 }
  0xec   :  { %v323_v43 = vpop.f32.mrf.mxu0  ;;  %v335_v44 = vpop.f32.mrf.mxu1 }
  0xed   :  { %264 = vst [vmem:[%s506_s3 + $0x8] sm:$0xff] %v236_v41  ;;  %268 = vst [vmem:[%s506_s3 + $0x28] sm:$0xff] %v252_v42  ;;  %v324_v45 = vadd.f32 %v323_v43, %v322_v39  ;;  %v336_v46 = vadd.f32 %v335_v44, %v334_v40 }
  0xee   :  { %v325_v47 = vpop.f32.mrf.mxu0  ;;  %v337_v48 = vpop.f32.mrf.mxu1 }
  0xef   :  { %v241_v49 = vadd.f32 %v324_v45, %v275_v26  ;;  %v257_v50 = vadd.f32 %v336_v46, %v275_v26 }
  0xf0   :  { %v326_v51 = vpop.f32.mrf.mxu0  ;;  %v338_v52 = vpop.f32.mrf.mxu1 }
  0xf1   :  { %265 = vst [vmem:[%s506_s3 + $0x10] sm:$0xff] %v241_v49  ;;  %269 = vst [vmem:[%s506_s3 + $0x30] sm:$0xff] %v257_v50  ;;  %v327_v53 = vadd.f32 %v326_v51, %v325_v47  ;;  %v339_v54 = vadd.f32 %v338_v52, %v337_v48 }
  0xf3   :  { %v244_v55 = vadd.f32 %v327_v53, %v275_v26  ;;  %v260_v56 = vadd.f32 %v339_v54, %v275_v26 }
  0xf5   :  { %266 = vst [vmem:[%s506_s3 + $0x18] sm:$0xff] %v244_v55  ;;  %270 = vst [vmem:[%s506_s3 + $0x38] sm:$0xff] %v260_v56 }

</bundles_post_ra>
